<compile_context>
chip_gen: v5e
topology: v5e:2x2
jax: 0.10.0
libtpu: 0.0.40
codegen_flags: <defaults>
</compile_context>

<pallas_src>
import functools

import jax
import jax.numpy as jnp
from jax.experimental import pallas as pl
from jax.experimental.pallas import tpu as pltpu


# ----------------------------- Pallas kernel ------------------------------- #
def _student_kernel(x_ref, w1t_ref, b1_ref, w2t_ref, b2_ref,
                    w3t_ref, b3_ref, wf_ref, bc_ref, out_ref):
    # x arrives f32 straight from HBM; cast to bf16 in-kernel (VPU work that
    # hides under the layer-1 matmul) instead of a separate XLA cast pass.
    x = x_ref[...].astype(w1t_ref.dtype)

    # layer 1: (Flatten done in wrapper) Linear -> Bias -> ReLU
    h1 = jnp.dot(x, w1t_ref[...], preferred_element_type=jnp.float32)
    h1 = jnp.maximum(h1 + b1_ref[...], 0.0)                      # (TB, H1) f32

    # layer 2: Linear -> MaxVolMaxPool (groups of 4) -> Bias -> ReLU
    # w2t columns are permuted so pooling groups are 4 contiguous slabs of width P
    h2p = jnp.dot(h1.astype(w2t_ref.dtype), w2t_ref[...],
                  preferred_element_type=jnp.float32)            # (TB, 4P)
    P = b2_ref.shape[1]
    pooled = jnp.maximum(
        jnp.maximum(h2p[:, 0 * P:1 * P], h2p[:, 1 * P:2 * P]),
        jnp.maximum(h2p[:, 2 * P:3 * P], h2p[:, 3 * P:4 * P]),
    )                                                            # (TB, P)
    h2 = jnp.maximum(pooled + b2_ref[...], 0.0)

    # layer 3: Linear -> Bias -> ReLU
    h3 = jnp.dot(h2.astype(w3t_ref.dtype), w3t_ref[...],
                 preferred_element_type=jnp.float32)
    h3 = jnp.maximum(h3 + b3_ref[...], 0.0)                      # (TB, H3)

    # Linear(V) -> Tensorise -> view -> classifier, fused into wf = (Wc @ V).T
    # (bf16, lane-padded to a multiple of 128 columns) -> one bf16 MXU matmul.
    out = jnp.dot(h3.astype(wf_ref.dtype), wf_ref[...],
                  preferred_element_type=jnp.float32)
    out_ref[...] = out + bc_ref[...]                             # (TB, NC_PAD)


# ----------------------- One-time parameter preprocessing ------------------- #
def prepare_student_params(w1, b1, w2, b2, w3, b3, v, wc, bc,
                           weight_dtype=jnp.bfloat16):
    """Hoisted out of the per-call path: transposes, pooling permutation,
    V/classifier fusion, lane padding, bf16 cast. Run once.

    Note: per-column-scaled int8 storage of w1/w2 was evaluated for v5e/v6e but
    rejected (see header) — the in-kernel dequant cost cancels the DMA saving.
    """
    H2 = w2.shape[0]
    assert H2 % 4 == 0
    P = H2 // 4
    # perm[j*P + g] = 4*g + j  -> member j of pooling group g goes to slab j, col g
    perm = (jnp.arange(4)[:, None] + 4 * jnp.arange(P)[None, :]).reshape(-1)

    nc = wc.shape[0]
    ncp = ((nc + 127) // 128) * 128            # lane-dense output width
    # Fuse: out = ((h3 @ V.T) @ Wc.T) + bc == h3 @ (Wc @ V).T + bc
    wf = (wc.astype(jnp.float32) @ v.astype(jnp.float32)).T      # (H3, nc)
    wf_pad = jnp.zeros((wf.shape[0], ncp), jnp.float32).at[:, :nc].set(wf)
    bc_pad = jnp.zeros((1, ncp), jnp.float32).at[:, :nc].set(
        bc.reshape(1, -1).astype(jnp.float32))

    params = {
        "w1t": w1.T.astype(weight_dtype),
        "b1": b1.reshape(1, -1).astype(jnp.float32),
        "w2t": w2.T[:, perm].astype(weight_dtype),
        "b2": b2.reshape(1, -1).astype(jnp.float32),
        "w3t": w3.T.astype(weight_dtype),
        "b3": b3.reshape(1, -1).astype(jnp.float32),
        "wf": wf_pad.astype(weight_dtype),     # bf16: single-pass MXU, half DMA
        "bc": bc_pad,
    }
    return jax.tree_util.tree_map(jax.block_until_ready, params)


# --------------------------- Batch-tile heuristic ---------------------------- #
def _round_up(n, m):
    return ((n + m - 1) // m) * m


def _choose_batch_tile(B):
    """Trace-time batch tile:
       * B <= 32: one full-dim tile (no padding op at tiny batch).
       * else: multiple of 8, capped at 256 (fills the 256-wide v6e/v7x MXU),
         with >= 2 grid points so v7x's two TensorCores both get work and
         activation/output DMAs pipeline across grid steps."""
    if B <= 32:
        return B
    n_tiles = max(2, pl.cdiv(B, 256))
    return _round_up(pl.cdiv(B, n_tiles), 8)


# ------------------------------- Forward wrapper ----------------------------- #
@functools.partial(jax.jit, static_argnames=("num_classes",))
def student_forward(x_nchw, params, *, num_classes):
    B = x_nchw.shape[0]
    d0, h1n = params["w1t"].shape
    _, h2n = params["w2t"].shape
    pn = params["b2"].shape[1]
    h3n = params["w3t"].shape[1]
    ncp = params["wf"].shape[1]

    # NCHW row-major flatten == torch .view(B, -1). Kept in f32 (single HBM
    # read); the bf16 cast happens inside the kernel.
    x_flat = x_nchw.reshape(B, -1)

    TB = _choose_batch_tile(B)
    B_pad = _round_up(B, TB)
    if B_pad > B:
        x_flat = jnp.pad(x_flat, ((0, B_pad - B), (0, 0)))
    nb = B_pad // TB

    xmap = lambda i: (i, 0)      # noqa: E731
    wmap = lambda i: (0, 0)      # noqa: E731 (weights resident across tiles)

    # Advisory cost estimate so XLA overlaps neighbouring ops with the kernel.
    flops = 2 * B_pad * (d0 * h1n + h1n * h2n + pn * h3n + h3n * ncp)
    weight_bytes = sum(int(p.size) * jnp.dtype(p.dtype).itemsize
                       for p in params.values())
    bytes_accessed = B_pad * d0 * 4 + weight_bytes + B_pad * ncp * 4

    out_padded = pl.pallas_call(
        _student_kernel,
        out_shape=jax.ShapeDtypeStruct((B_pad, ncp), jnp.float32),
        grid=(nb,),
        in_specs=[
            pl.BlockSpec((TB, d0), xmap),
            pl.BlockSpec(params["w1t"].shape, wmap),
            pl.BlockSpec(params["b1"].shape, wmap),
            pl.BlockSpec(params["w2t"].shape, wmap),
            pl.BlockSpec(params["b2"].shape, wmap),
            pl.BlockSpec(params["w3t"].shape, wmap),
            pl.BlockSpec(params["b3"].shape, wmap),
            pl.BlockSpec(params["wf"].shape, wmap),
            pl.BlockSpec(params["bc"].shape, wmap),
        ],
        out_specs=pl.BlockSpec((TB, ncp), xmap),
        compiler_params=pltpu.CompilerParams(
            dimension_semantics=("parallel",)),
        cost_estimate=pl.CostEstimate(
            flops=flops, transcendentals=0, bytes_accessed=bytes_accessed),
    )(x_flat, params["w1t"], params["b1"], params["w2t"], params["b2"],
      params["w3t"], params["b3"], params["wf"], params["bc"])

    # Consumers that tolerate a lane-padded (B, 128) output can take out_padded
    # directly and fuse the class slice into their loss/argmax.
    return out_padded[:B, :num_classes]


# --------------------------- Pure-JAX f32 reference -------------------------- #
def student_reference(x_nchw, w1, b1, w2, b2, w3, b3, v, wc, bc, tensorise_shape):
    B = x_nchw.shape[0]
    h = x_nchw.reshape(B, -1)                       # Flatten
    h = jnp.maximum(h @ w1.T + b1, 0.0)             # Linear -> Bias -> ReLU
    h = h @ w2.T                                    # Linear
    h = h.reshape(B, -1, 4).max(axis=-1)            # MaxVolMaxPool == max over groups of 4
    h = jnp.maximum(h + b2, 0.0)                    # Bias -> ReLU
    h = jnp.maximum(h @ w3.T + b3, 0.0)             # Linear -> Bias -> ReLU
    h = h @ v.T                                     # Linear(V)
    h = h.reshape(B, *tensorise_shape).reshape(B, -1)  # Tensorise + Student view (no-op)
    return h @ wc.T + bc                            # classifier


# ---------------------------------- Main ------------------------------------ #
if __name__ == "__main__":
    key = jax.random.PRNGKey(0)
    ks = jax.random.split(key, 10)

    # Small shapes consistent with the module's construction
    B, C, H, W = 2, 4, 16, 16
    D0 = C * H * W        # 1024
    H1 = 256
    H2 = 512              # pooled -> 128
    H2P = H2 // 4
    H3 = 64
    TSHAPE = (4, 4, 8)    # Tensorise target shape, prod = 128
    VOUT = TSHAPE[0] * TSHAPE[1] * TSHAPE[2]
    NUM_CLASSES = 10

    x = jax.random.normal(ks[0], (B, C, H, W), jnp.float32)

    scale = 0.05
    w1 = scale * jax.random.normal(ks[1], (H1, D0), jnp.float32)
    b1 = scale * jax.random.normal(ks[2], (H1,), jnp.float32)
    w2 = scale * jax.random.normal(ks[3], (H2, H1), jnp.float32)
    b2 = scale * jax.random.normal(ks[4], (H2P,), jnp.float32)
    w3 = scale * jax.random.normal(ks[5], (H3, H2P), jnp.float32)
    b3 = scale * jax.random.normal(ks[6], (H3,), jnp.float32)
    v = scale * jax.random.normal(ks[7], (VOUT, H3), jnp.float32)
    wc = scale * jax.random.normal(ks[8], (NUM_CLASSES, VOUT), jnp.float32)
    bc = scale * jax.random.normal(ks[9], (NUM_CLASSES,), jnp.float32)

    # One-time parameter preparation (hoisted out of the per-call path).
    params = prepare_student_params(w1, b1, w2, b2, w3, b3, v, wc, bc)

    out = student_forward(x, params, num_classes=NUM_CLASSES)
    out = jax.block_until_ready(out)

    ref = student_reference(x, w1, b1, w2, b2, w3, b3, v, wc, bc, TSHAPE)
    assert out.shape == (B, NUM_CLASSES)
    # bf16 weight/activation storage (f32 MXU accumulation) => looser tolerance
    # than the pure-f32 reference; errors here are ~1e-3 on outputs of ~1e-1.
    assert jnp.allclose(out, ref, atol=1e-2, rtol=1e-2), "mismatch vs reference"

    print("KERNEL_OK")
</pallas_src>

<mosaic_0001>
module attributes {stable_mosaic.version = 11 : i64} {
  func.func @_student_kernel(%arg0: i32, %arg1: memref<2x1024xf32, #tpu.memory_space<vmem>>, %arg2: memref<1024x256xbf16, #tpu.memory_space<vmem>>, %arg3: memref<1x256xf32, #tpu.memory_space<vmem>>, %arg4: memref<256x512xbf16, #tpu.memory_space<vmem>>, %arg5: memref<1x128xf32, #tpu.memory_space<vmem>>, %arg6: memref<128x64xbf16, #tpu.memory_space<vmem>>, %arg7: memref<1x64xf32, #tpu.memory_space<vmem>>, %arg8: memref<64x128xbf16, #tpu.memory_space<vmem>>, %arg9: memref<1x128xf32, #tpu.memory_space<vmem>>, %arg10: memref<2x128xf32, #tpu.memory_space<vmem>>) attributes {dimension_semantics = [#tpu.dimension_semantics<parallel>], iteration_bounds = array<i64: 1>, scalar_prefetch = 0 : i64, scratch_operands = 0 : i64, tpu.core_type = #tpu.core_type<tc>, window_params = [{transform_indices = @transform_0, window_bounds = array<i64: 2, 1024>}, {pipeline_mode = #tpu.pipeline_mode<synchronous>, transform_indices = @transform_1, window_bounds = array<i64: 1024, 256>}, {pipeline_mode = #tpu.pipeline_mode<synchronous>, transform_indices = @transform_2, window_bounds = array<i64: 1, 256>}, {pipeline_mode = #tpu.pipeline_mode<synchronous>, transform_indices = @transform_3, window_bounds = array<i64: 256, 512>}, {pipeline_mode = #tpu.pipeline_mode<synchronous>, transform_indices = @transform_4, window_bounds = array<i64: 1, 128>}, {pipeline_mode = #tpu.pipeline_mode<synchronous>, transform_indices = @transform_5, window_bounds = array<i64: 128, 64>}, {pipeline_mode = #tpu.pipeline_mode<synchronous>, transform_indices = @transform_6, window_bounds = array<i64: 1, 64>}, {pipeline_mode = #tpu.pipeline_mode<synchronous>, transform_indices = @transform_7, window_bounds = array<i64: 64, 128>}, {pipeline_mode = #tpu.pipeline_mode<synchronous>, transform_indices = @transform_8, window_bounds = array<i64: 1, 128>}, {transform_indices = @transform_9, window_bounds = array<i64: 2, 128>}]} {
    %c0 = arith.constant 0 : index
    %c0_0 = arith.constant 0 : index
    %0 = vector.load %arg1[%c0, %c0_0] : memref<2x1024xf32, #tpu.memory_space<vmem>>, vector<2x1024xf32>
    %1 = arith.truncf %0 : vector<2x1024xf32> to vector<2x1024xbf16>
    %c0_1 = arith.constant 0 : index
    %c0_2 = arith.constant 0 : index
    %2 = vector.load %arg2[%c0_1, %c0_2] : memref<1024x256xbf16, #tpu.memory_space<vmem>>, vector<1024x256xbf16>
    %cst = arith.constant dense<0.000000e+00> : vector<2x256xf32>
    %3 = tpu.matmul %1, %2, %cst {dimension_numbers = #tpu.dot_dimension_numbers<[1], [0], [0], [1], [0, 0, 1, 1], [], []>} : vector<2x1024xbf16>, vector<1024x256xbf16>, vector<2x256xf32> -> vector<2x256xf32>
    %c0_3 = arith.constant 0 : index
    %c0_4 = arith.constant 0 : index
    %4 = vector.load %arg3[%c0_3, %c0_4] : memref<1x256xf32, #tpu.memory_space<vmem>>, vector<1x256xf32>
    %5 = vector.broadcast %4 : vector<1x256xf32> to vector<2x256xf32>
    %6 = arith.addf %3, %5 : vector<2x256xf32>
    %cst_5 = arith.constant 0.000000e+00 : f32
    %7 = vector.broadcast %cst_5 : f32 to vector<2x256xf32>
    %8 = arith.maximumf %6, %7 : vector<2x256xf32>
    %9 = arith.truncf %8 : vector<2x256xf32> to vector<2x256xbf16>
    %c0_6 = arith.constant 0 : index
    %c0_7 = arith.constant 0 : index
    %10 = vector.load %arg4[%c0_6, %c0_7] : memref<256x512xbf16, #tpu.memory_space<vmem>>, vector<256x512xbf16>
    %cst_8 = arith.constant dense<0.000000e+00> : vector<2x512xf32>
    %11 = tpu.matmul %9, %10, %cst_8 {dimension_numbers = #tpu.dot_dimension_numbers<[1], [0], [0], [1], [0, 0, 1, 1], [], []>} : vector<2x256xbf16>, vector<256x512xbf16>, vector<2x512xf32> -> vector<2x512xf32>
    %12 = vector.extract_strided_slice %11 {offsets = [0, 0], sizes = [2, 128], strides = [1, 1]} : vector<2x512xf32> to vector<2x128xf32>
    %13 = vector.extract_strided_slice %11 {offsets = [0, 128], sizes = [2, 128], strides = [1, 1]} : vector<2x512xf32> to vector<2x128xf32>
    %14 = arith.maximumf %12, %13 : vector<2x128xf32>
    %15 = vector.extract_strided_slice %11 {offsets = [0, 256], sizes = [2, 128], strides = [1, 1]} : vector<2x512xf32> to vector<2x128xf32>
    %16 = vector.extract_strided_slice %11 {offsets = [0, 384], sizes = [2, 128], strides = [1, 1]} : vector<2x512xf32> to vector<2x128xf32>
    %17 = arith.maximumf %15, %16 : vector<2x128xf32>
    %18 = arith.maximumf %14, %17 : vector<2x128xf32>
    %c0_9 = arith.constant 0 : index
    %c0_10 = arith.constant 0 : index
    %19 = vector.load %arg5[%c0_9, %c0_10] : memref<1x128xf32, #tpu.memory_space<vmem>>, vector<1x128xf32>
    %20 = vector.broadcast %19 : vector<1x128xf32> to vector<2x128xf32>
    %21 = arith.addf %18, %20 : vector<2x128xf32>
    %cst_11 = arith.constant 0.000000e+00 : f32
    %22 = vector.broadcast %cst_11 : f32 to vector<2x128xf32>
    %23 = arith.maximumf %21, %22 : vector<2x128xf32>
    %24 = arith.truncf %23 : vector<2x128xf32> to vector<2x128xbf16>
    %c0_12 = arith.constant 0 : index
    %c0_13 = arith.constant 0 : index
    %25 = vector.load %arg6[%c0_12, %c0_13] : memref<128x64xbf16, #tpu.memory_space<vmem>>, vector<128x64xbf16>
    %cst_14 = arith.constant dense<0.000000e+00> : vector<2x64xf32>
    %26 = tpu.matmul %24, %25, %cst_14 {dimension_numbers = #tpu.dot_dimension_numbers<[1], [0], [0], [1], [0, 0, 1, 1], [], []>} : vector<2x128xbf16>, vector<128x64xbf16>, vector<2x64xf32> -> vector<2x64xf32>
    %c0_15 = arith.constant 0 : index
    %c0_16 = arith.constant 0 : index
    %27 = vector.load %arg7[%c0_15, %c0_16] : memref<1x64xf32, #tpu.memory_space<vmem>>, vector<1x64xf32>
    %28 = vector.broadcast %27 : vector<1x64xf32> to vector<2x64xf32>
    %29 = arith.addf %26, %28 : vector<2x64xf32>
    %cst_17 = arith.constant 0.000000e+00 : f32
    %30 = vector.broadcast %cst_17 : f32 to vector<2x64xf32>
    %31 = arith.maximumf %29, %30 : vector<2x64xf32>
    %32 = arith.truncf %31 : vector<2x64xf32> to vector<2x64xbf16>
    %c0_18 = arith.constant 0 : index
    %c0_19 = arith.constant 0 : index
    %33 = vector.load %arg8[%c0_18, %c0_19] : memref<64x128xbf16, #tpu.memory_space<vmem>>, vector<64x128xbf16>
    %cst_20 = arith.constant dense<0.000000e+00> : vector<2x128xf32>
    %34 = tpu.matmul %32, %33, %cst_20 {dimension_numbers = #tpu.dot_dimension_numbers<[1], [0], [0], [1], [0, 0, 1, 1], [], []>} : vector<2x64xbf16>, vector<64x128xbf16>, vector<2x128xf32> -> vector<2x128xf32>
    %c0_21 = arith.constant 0 : index
    %c0_22 = arith.constant 0 : index
    %35 = vector.load %arg9[%c0_21, %c0_22] : memref<1x128xf32, #tpu.memory_space<vmem>>, vector<1x128xf32>
    %36 = vector.broadcast %35 : vector<1x128xf32> to vector<2x128xf32>
    %37 = arith.addf %34, %36 : vector<2x128xf32>
    %c0_23 = arith.constant 0 : index
    %c0_24 = arith.constant 0 : index
    %38 = vector.load %arg10[%c0_23, %c0_24] : memref<2x128xf32, #tpu.memory_space<vmem>>, vector<2x128xf32>
    tpu.vector_store %arg10[%c0_23, %c0_24], %37 {strides = array<i32>} : memref<2x128xf32, #tpu.memory_space<vmem>>, vector<2x128xf32>,
    return
  }
  func.func @transform_0(%arg0: i32) -> (i32, i32) {
    %c0_i32 = arith.constant 0 : i32
    %c0_i32_0 = arith.constant 0 : i32
    return %arg0, %c0_i32 : i32, i32
  }
  func.func @transform_1(%arg0: i32) -> (i32, i32) {
    %c0_i32 = arith.constant 0 : i32
    %c0_i32_0 = arith.constant 0 : i32
    %c0_i32_1 = arith.constant 0 : i32
    return %c0_i32, %c0_i32_0 : i32, i32
  }
  func.func @transform_2(%arg0: i32) -> (i32, i32) {
    %c0_i32 = arith.constant 0 : i32
    %c0_i32_0 = arith.constant 0 : i32
    %c0_i32_1 = arith.constant 0 : i32
    return %c0_i32, %c0_i32_0 : i32, i32
  }
  func.func @transform_3(%arg0: i32) -> (i32, i32) {
    %c0_i32 = arith.constant 0 : i32
    %c0_i32_0 = arith.constant 0 : i32
    %c0_i32_1 = arith.constant 0 : i32
    return %c0_i32, %c0_i32_0 : i32, i32
  }
  func.func @transform_4(%arg0: i32) -> (i32, i32) {
    %c0_i32 = arith.constant 0 : i32
    %c0_i32_0 = arith.constant 0 : i32
    %c0_i32_1 = arith.constant 0 : i32
    return %c0_i32, %c0_i32_0 : i32, i32
  }
  func.func @transform_5(%arg0: i32) -> (i32, i32) {
    %c0_i32 = arith.constant 0 : i32
    %c0_i32_0 = arith.constant 0 : i32
    %c0_i32_1 = arith.constant 0 : i32
    return %c0_i32, %c0_i32_0 : i32, i32
  }
  func.func @transform_6(%arg0: i32) -> (i32, i32) {
    %c0_i32 = arith.constant 0 : i32
    %c0_i32_0 = arith.constant 0 : i32
    %c0_i32_1 = arith.constant 0 : i32
    return %c0_i32, %c0_i32_0 : i32, i32
  }
  func.func @transform_7(%arg0: i32) -> (i32, i32) {
    %c0_i32 = arith.constant 0 : i32
    %c0_i32_0 = arith.constant 0 : i32
    %c0_i32_1 = arith.constant 0 : i32
    return %c0_i32, %c0_i32_0 : i32, i32
  }
  func.func @transform_8(%arg0: i32) -> (i32, i32) {
    %c0_i32 = arith.constant 0 : i32
    %c0_i32_0 = arith.constant 0 : i32
    %c0_i32_1 = arith.constant 0 : i32
    return %c0_i32, %c0_i32_0 : i32, i32
  }
  func.func @transform_9(%arg0: i32) -> (i32, i32) {
    %c0_i32 = arith.constant 0 : i32
    %c0_i32_0 = arith.constant 0 : i32
    return %arg0, %c0_i32 : i32, i32
  }
}

</mosaic_0001>

<bundles_post_ra>
// kernel: student_forward.1
= control target key start
LH: loop header
LB: loop body
LE: loop exit
PB: predicated region body
PF: predicated region fallthrough
CT: control target
= control target key end

     0   :  { %14 = vsyncpa [#allocation3], 0  ;;  %s3001_s0 = inlined_call_operand.vmem [shape: f32[2,1024], index: 0, kind: input, shape index: {}]   ;;  %s3002_s1 = inlined_call_operand.hbm [shape: bf16[1024,256], index: 1, kind: input, shape index: {}]   ;;  %s3003_s2 = inlined_call_operand.vmem [shape: f32[1,256], index: 2, kind: input, shape index: {}]   ;;  %s3004_s3 = inlined_call_operand.hbm [shape: bf16[256,512], index: 3, kind: input, shape index: {}]   ;;  %s3005_s4 = inlined_call_operand.vmem [shape: f32[1,128], index: 4, kind: input, shape index: {}]   ;;  %s3006_s5 = inlined_call_operand.vmem [shape: bf16[128,64], index: 5, kind: input, shape index: {}]   ;;  %s3007_s6 = inlined_call_operand.vmem [shape: f32[1,64], index: 6, kind: input, shape index: {}]   ;;  %s3008_s7 = inlined_call_operand.vmem [shape: bf16[64,128], index: 7, kind: input, shape index: {}]   ;;  %s3009_s8 = inlined_call_operand.vmem [shape: f32[1,128], index: 8, kind: input, shape index: {}]   ;;  %s3010_s9 = inlined_call_operand.hbm [shape: f32[2,128], index: 9, kind: output, shape index: {}]  }
   0x1   :  { %15 = vsyncpa [#allocation6], 0 }
   0x2   :  { %16 = vsyncpa [#allocation4], 0  ;;  %s23_s11 = sshll.u32 %s3002_s1, 4  ;;  %s2845_s12 = smov [#allocation2]   ;;  %s24_s11 = int_to_ptr.hbm [resolvable:$true] %s23_s11 }
   0x3   :  { %s25_s13 = sshll.u32 %s2845_s12, 4  ;;  %s38_s16 = sshll.u32 %s3004_s3, 4  ;;  %s26_s13 = int_to_ptr.vmem [resolvable:$true] %s25_s13  ;;  %s39_s16 = int_to_ptr.hbm [resolvable:$true] %s38_s16 }
   0x4   :  { %s2846_s17 = smov 128   ;;  %s2847_s18 = smov 8  }
   0x5   :  { %31 = dma.hbm_to_vmem [thread:$0]  %s24_s11, 16384, %s26_s13, [#allocation3], %s2846_s17, %s2846_s17, %s2847_s18  }
   0x6   :  { %s2848_s19 = smov [#allocation5]   ;;  %s2849_s21 = smov 256  }
   0x7   :  { %s40_s20 = sshll.u32 %s2848_s19, 4  ;;  %s2850_s22 = smov 16   ;;  %s41_s20 = int_to_ptr.vmem [resolvable:$true] %s40_s20 }
   0x8   :  { %46 = dma.hbm_to_vmem [thread:$0]  %s39_s16, 8192, %s41_s20, [#allocation6], %s2849_s21, %s2849_s21, %s2850_s22  }
   0x9   :  { %2839 = dma.done.wait [#allocation3], 16384  }
   0xa   :  { %2840 = vsyncadd [#allocation3], 4294950912 }
   0xb   :  { %2841 = dma.done.wait [#allocation6], 8192  }
   0xc   :  { %2842 = vsyncadd [#allocation6], 4294959104  ;;  %v1794_v0 = vld [vmem:[#allocation2 + $0x70] sm:$0xf]  ;;  %v2568_v1 = vld [vmem:[#allocation2 + $0x74] sm:$0xf0] }
   0xd   :  { %v1858_v2 = vld [vmem:[#allocation2 + $0xf0] sm:$0xf]  ;;  %v1795_v3 = vor.u32 %v2568_v1, %v1794_v0  ;;  %v2584_v4 = vld [vmem:[#allocation2 + $0xf4] sm:$0xf0]  ;;  %v1786_v11 = vld [vmem:[#allocation2 + $0x60] sm:$0xf] }
   0xe   :  { %v1922_v5 = vld [vmem:[#allocation2 + $0x170] sm:$0xf]  ;;  %v2600_v6 = vld [vmem:[#allocation2 + $0x174] sm:$0xf0]  ;;  %v1859_v7 = vor.u32 %v2584_v4, %v1858_v2  ;;  %v2566_v13 = vld [vmem:[#allocation2 + $0x64] sm:$0xf0] }
   0xf   :  { %v1923_v8 = vor.u32 %v2600_v6, %v1922_v5  ;;  %v1986_v9 = vld [vmem:[#allocation2 + $0x1f0] sm:$0xf]  ;;  %v2616_v10 = vld [vmem:[#allocation2 + $0x1f4] sm:$0xf0]  ;;  %871 = vmatpush.bf16.msra.mxu0 %v1795_v3  ;;  %v1850_v14 = vld [vmem:[#allocation2 + $0xe0] sm:$0xf]  ;;  %v1787_v16 = vor.u32 %v2566_v13, %v1786_v11 }
  0x10   :  { %v1987_v12 = vor.u32 %v2616_v10, %v1986_v9  ;;  %v2582_v15 = vld [vmem:[#allocation2 + $0xe4] sm:$0xf0]  ;;  %884 = vmatpush.bf16.msra.mxu1 %v1859_v7  ;;  %v1914_v18 = vld [vmem:[#allocation2 + $0x160] sm:$0xf]  ;;  %v1778_v23 = vld [vmem:[#allocation2 + $0x50] sm:$0xf] }
  0x11   :  { %897 = vmatpush.bf16.msra.mxu2 %v1923_v8  ;;  %v1851_v17 = vor.u32 %v2582_v15, %v1850_v14  ;;  %v2598_v19 = vld [vmem:[#allocation2 + $0x164] sm:$0xf0]  ;;  %v1978_v20 = vld [vmem:[#allocation2 + $0x1e0] sm:$0xf]  ;;  %v2564_v24 = vld [vmem:[#allocation2 + $0x54] sm:$0xf0] }
  0x12   :  { %910 = vmatpush.bf16.msra.mxu3 %v1987_v12  ;;  %v1915_v21 = vor.u32 %v2598_v19, %v1914_v18  ;;  %v2614_v22 = vld [vmem:[#allocation2 + $0x1e4] sm:$0xf0]  ;;  %v1842_v26 = vld [vmem:[#allocation2 + $0xd0] sm:$0xf]  ;;  %v2580_v27 = vld [vmem:[#allocation2 + $0xd4] sm:$0xf0]  ;;  %v1779_v29 = vor.u32 %v2564_v24, %v1778_v23 }
  0x13   :  { %v1979_v25 = vor.u32 %v2614_v22, %v1978_v20  ;;  %v1906_v28 = vld [vmem:[#allocation2 + $0x150] sm:$0xf]  ;;  %872 = vmatpush.bf16.msra.mxu0 %v1787_v16  ;;  %v2596_v30 = vld [vmem:[#allocation2 + $0x154] sm:$0xf0]  ;;  %v1843_v33 = vor.u32 %v2580_v27, %v1842_v26  ;;  %v1770_v35 = vld [vmem:[#allocation2 + $0x40] sm:$0xf] }
  0x14   :  { %v1970_v31 = vld [vmem:[#allocation2 + $0x1d0] sm:$0xf]  ;;  %v2612_v32 = vld [vmem:[#allocation2 + $0x1d4] sm:$0xf0]  ;;  %885 = vmatpush.bf16.msra.mxu1 %v1851_v17  ;;  %v1907_v34 = vor.u32 %v2596_v30, %v1906_v28  ;;  %v2562_v36 = vld [vmem:[#allocation2 + $0x44] sm:$0xf0] }
  0x15   :  { %898 = vmatpush.bf16.msra.mxu2 %v1915_v21  ;;  %v1834_v37 = vld [vmem:[#allocation2 + $0xc0] sm:$0xf]  ;;  %v1971_v38 = vor.u32 %v2612_v32, %v1970_v31  ;;  %v2578_v39 = vld [vmem:[#allocation2 + $0xc4] sm:$0xf0]  ;;  %v1771_v44 = vor.u32 %v2562_v36, %v1770_v35  ;;  %v1762_v47 = vld [vmem:[#allocation2 + $0x30] sm:$0xf] }
  0x16   :  { %911 = vmatpush.bf16.msra.mxu3 %v1979_v25  ;;  %v1898_v40 = vld [vmem:[#allocation2 + $0x140] sm:$0xf]  ;;  %v2594_v41 = vld [vmem:[#allocation2 + $0x144] sm:$0xf0]  ;;  %v1835_v45 = vor.u32 %v2578_v39, %v1834_v37  ;;  %v2560_v48 = vld [vmem:[#allocation2 + $0x34] sm:$0xf0] }
  0x17   :  { %v1962_v42 = vld [vmem:[#allocation2 + $0x1c0] sm:$0xf]  ;;  %v2610_v43 = vld [vmem:[#allocation2 + $0x1c4] sm:$0xf0]  ;;  %873 = vmatpush.bf16.msra.mxu0 %v1779_v29  ;;  %v1899_v46 = vor.u32 %v2594_v41, %v1898_v40  ;;  %v1826_v49 = vld [vmem:[#allocation2 + $0xb0] sm:$0xf]  ;;  %v1763_v56 = vor.u32 %v2560_v48, %v1762_v47 }
  0x18   :  { %886 = vmatpush.bf16.msra.mxu1 %v1843_v33  ;;  %v1963_v50 = vor.u32 %v2610_v43, %v1962_v42  ;;  %v2576_v51 = vld [vmem:[#allocation2 + $0xb4] sm:$0xf0]  ;;  %v1890_v52 = vld [vmem:[#allocation2 + $0x130] sm:$0xf]  ;;  %v1754_v59 = vld [vmem:[#allocation2 + $0x20] sm:$0xf] }
  0x19   :  { %899 = vmatpush.bf16.msra.mxu2 %v1907_v34  ;;  %v2592_v53 = vld [vmem:[#allocation2 + $0x134] sm:$0xf0]  ;;  %v1954_v54 = vld [vmem:[#allocation2 + $0x1b0] sm:$0xf]  ;;  %v1827_v57 = vor.u32 %v2576_v51, %v1826_v49  ;;  %v2558_v60 = vld [vmem:[#allocation2 + $0x24] sm:$0xf0] }
  0x1a   :  { %912 = vmatpush.bf16.msra.mxu3 %v1971_v38  ;;  %v2608_v55 = vld [vmem:[#allocation2 + $0x1b4] sm:$0xf0]  ;;  %v1891_v58 = vor.u32 %v2592_v53, %v1890_v52  ;;  %v1818_v61 = vld [vmem:[#allocation2 + $0xa0] sm:$0xf]  ;;  %v2574_v63 = vld [vmem:[#allocation2 + $0xa4] sm:$0xf0]  ;;  %v1755_v4 = vor.u32 %v2558_v60, %v1754_v59 }
  0x1b   :  { %874 = vmatpush.bf16.msra.mxu0 %v1771_v44  ;;  %v1955_v62 = vor.u32 %v2608_v55, %v1954_v54  ;;  %v1882_v0 = vld [vmem:[#allocation2 + $0x120] sm:$0xf]  ;;  %v2590_v1 = vld [vmem:[#allocation2 + $0x124] sm:$0xf0]  ;;  %v1819_v5 = vor.u32 %v2574_v63, %v1818_v61  ;;  %v1746_v7 = vld [vmem:[#allocation2 + $0x10] sm:$0xf] }
  0x1c   :  { %887 = vmatpush.bf16.msra.mxu1 %v1835_v45  ;;  %v1946_v2 = vld [vmem:[#allocation2 + $0x1a0] sm:$0xf]  ;;  %v2606_v3 = vld [vmem:[#allocation2 + $0x1a4] sm:$0xf0]  ;;  %v1883_v6 = vor.u32 %v2590_v1, %v1882_v0  ;;  %v2556_v8 = vld [vmem:[#allocation2 + $0x14] sm:$0xf0] }
  0x1d   :  { %900 = vmatpush.bf16.msra.mxu2 %v1899_v46  ;;  %v1810_v9 = vld [vmem:[#allocation2 + $0x90] sm:$0xf]  ;;  %v1947_v10 = vor.u32 %v2606_v3, %v1946_v2  ;;  %v2572_v11 = vld [vmem:[#allocation2 + $0x94] sm:$0xf0]  ;;  %v1747_v16 = vor.u32 %v2556_v8, %v1746_v7  ;;  %v1738_v17 = vld [vmem:[#allocation2] sm:$0xf] }
  0x1e   :  { %913 = vmatpush.bf16.msra.mxu3 %v1963_v50  ;;  %v1874_v12 = vld [vmem:[#allocation2 + $0x110] sm:$0xf]  ;;  %v2588_v13 = vld [vmem:[#allocation2 + $0x114] sm:$0xf0]  ;;  %v2554_v18 = vld [vmem:[#allocation2 + $0x4] sm:$0xf0]  ;;  %v1811_v19 = vor.u32 %v2572_v11, %v1810_v9 }
  0x1f   :  { %875 = vmatpush.bf16.msra.mxu0 %v1763_v56  ;;  %v1938_v14 = vld [vmem:[#allocation2 + $0x190] sm:$0xf]  ;;  %v2604_v15 = vld [vmem:[#allocation2 + $0x194] sm:$0xf0]  ;;  %v1875_v20 = vor.u32 %v2588_v13, %v1874_v12  ;;  %v1802_v21 = vld [vmem:[#allocation2 + $0x80] sm:$0xf]  ;;  %v1739_v31 = vor.u32 %v2554_v18, %v1738_v17 }
  0x20   :  { %888 = vmatpush.bf16.msra.mxu1 %v1827_v57  ;;  %v2570_v22 = vld [vmem:[#allocation2 + $0x84] sm:$0xf0]  ;;  %v1866_v23 = vld [vmem:[#allocation2 + $0x100] sm:$0xf]  ;;  %v1939_v24 = vor.u32 %v2604_v15, %v1938_v14  ;;  %v2050_v28 = vld [vmem:[#allocation2 + $0x270] sm:$0xf] }
  0x21   :  { %901 = vmatpush.bf16.msra.mxu2 %v1891_v58  ;;  %v2586_v25 = vld [vmem:[#allocation2 + $0x104] sm:$0xf0]  ;;  %v1930_v26 = vld [vmem:[#allocation2 + $0x180] sm:$0xf]  ;;  %v2632_v29 = vld [vmem:[#allocation2 + $0x274] sm:$0xf0]  ;;  %v1803_v35 = vor.u32 %v2570_v22, %v1802_v21 }
  0x22   :  { %914 = vmatpush.bf16.msra.mxu3 %v1955_v62  ;;  %v2602_v27 = vld [vmem:[#allocation2 + $0x184] sm:$0xf0]  ;;  %v2114_v30 = vld [vmem:[#allocation2 + $0x2f0] sm:$0xf]  ;;  %v2648_v32 = vld [vmem:[#allocation2 + $0x2f4] sm:$0xf0]  ;;  %v1867_v36 = vor.u32 %v2586_v25, %v1866_v23  ;;  %v2051_v40 = vor.u32 %v2632_v29, %v2050_v28 }
  0x23   :  { %876 = vmatpush.bf16.msra.mxu0 %v1755_v4  ;;  %v2178_v33 = vld [vmem:[#allocation2 + $0x370] sm:$0xf]  ;;  %v2664_v34 = vld [vmem:[#allocation2 + $0x374] sm:$0xf0]  ;;  %v1931_v39 = vor.u32 %v2602_v27, %v1930_v26  ;;  %v2115_v41 = vor.u32 %v2648_v32, %v2114_v30  ;;  %v2042_v43 = vld [vmem:[#allocation2 + $0x260] sm:$0xf] }
  0x24   :  { %889 = vmatpush.bf16.msra.mxu1 %v1819_v5  ;;  %v2242_v37 = vld [vmem:[#allocation2 + $0x3f0] sm:$0xf]  ;;  %v2680_v38 = vld [vmem:[#allocation2 + $0x3f4] sm:$0xf0]  ;;  %v2179_v42 = vor.u32 %v2664_v34, %v2178_v33  ;;  %v2630_v44 = vld [vmem:[#allocation2 + $0x264] sm:$0xf0] }
  0x25   :  { %902 = vmatpush.bf16.msra.mxu2 %v1883_v6  ;;  %v2106_v45 = vld [vmem:[#allocation2 + $0x2e0] sm:$0xf]  ;;  %v2243_v46 = vor.u32 %v2680_v38, %v2242_v37  ;;  %v2646_v47 = vld [vmem:[#allocation2 + $0x2e4] sm:$0xf0]  ;;  %v66_v52 = vld [vmem:[%s3001_s0] sm:$0xff]  ;;  %v2043_v53 = vor.u32 %v2630_v44, %v2042_v43  ;;  %vm1700_vm0 = vcmask 523264  }
  0x26   :  { %915 = vmatpush.bf16.msra.mxu3 %v1947_v10  ;;  %v2170_v48 = vld [vmem:[#allocation2 + $0x360] sm:$0xf]  ;;  %v2662_v49 = vld [vmem:[#allocation2 + $0x364] sm:$0xf0]  ;;  %70 = vst [vmem:[#allocation1] ss:$4 sm:$0xff] %v66_v52  ;;  %v2107_v54 = vor.u32 %v2646_v47, %v2106_v45 }
  0x27   :  { %877 = vmatpush.bf16.msra.mxu0 %v1747_v16  ;;  %v2234_v50 = vld [vmem:[#allocation2 + $0x3e0] sm:$0xf]  ;;  %v2678_v51 = vld [vmem:[#allocation2 + $0x3e4] sm:$0xf0]  ;;  %v2171_v55 = vor.u32 %v2662_v49, %v2170_v48  ;;  %v2034_v56 = vld [vmem:[#allocation2 + $0x250] sm:$0xf] }
  0x28   :  { %890 = vmatpush.bf16.msra.mxu1 %v1811_v19  ;;  %v2628_v57 = vld [vmem:[#allocation2 + $0x254] sm:$0xf0]  ;;  %v2098_v58 = vld [vmem:[#allocation2 + $0x2d0] sm:$0xf]  ;;  %v2235_v59 = vor.u32 %v2678_v51, %v2234_v50  ;;  %v2026_v2 = vld [vmem:[#allocation2 + $0x240] sm:$0xf] }
  0x29   :  { %903 = vmatpush.bf16.msra.mxu2 %v1875_v20  ;;  %v2644_v60 = vld [vmem:[#allocation2 + $0x2d4] sm:$0xf0]  ;;  %v2162_v61 = vld [vmem:[#allocation2 + $0x350] sm:$0xf]  ;;  %v2035_v1 = vor.u32 %v2628_v57, %v2034_v56  ;;  %v2626_v3 = vld [vmem:[#allocation2 + $0x244] sm:$0xf0] }
  0x2a   :  { %916 = vmatpush.bf16.msra.mxu3 %v1939_v24  ;;  %v2660_v62 = vld [vmem:[#allocation2 + $0x354] sm:$0xf0]  ;;  %v2226_v63 = vld [vmem:[#allocation2 + $0x3d0] sm:$0xf]  ;;  %v2099_v4 = vor.u32 %v2644_v60, %v2098_v58  ;;  %v2090_v6 = vld [vmem:[#allocation2 + $0x2c0] sm:$0xf]  ;;  %v2027_v15 = vor.u32 %v2626_v3, %v2026_v2 }
  0x2b   :  { %878 = vmatpush.bf16.msra.mxu0 %v1739_v31  ;;  %v2676_v0 = vld [vmem:[#allocation2 + $0x3d4] sm:$0xf0]  ;;  %v2163_v5 = vor.u32 %v2660_v62, %v2162_v61  ;;  %v2642_v7 = vld [vmem:[#allocation2 + $0x2c4] sm:$0xf0]  ;;  %v2154_v8 = vld [vmem:[#allocation2 + $0x340] sm:$0xf] }
  0x2c   :  { %891 = vmatpush.bf16.msra.mxu1 %v1803_v35  ;;  %v2227_v9 = vor.u32 %v2676_v0, %v2226_v63  ;;  %v2658_v10 = vld [vmem:[#allocation2 + $0x344] sm:$0xf0]  ;;  %v2218_v11 = vld [vmem:[#allocation2 + $0x3c0] sm:$0xf]  ;;  %v2091_v16 = vor.u32 %v2642_v7, %v2090_v6  ;;  %v2018_v22 = vld [vmem:[#allocation2 + $0x230] sm:$0xf] }
  0x2d   :  { %904 = vmatpush.bf16.msra.mxu2 %v1867_v36  ;;  %v2674_v12 = vld [vmem:[#allocation2 + $0x3c4] sm:$0xf0]  ;;  %v73_v14 = vld.sshfl [vmem:[#allocation1] sm:$0xff pattern:$0x73625140]  ;;  %v2155_v21 = vor.u32 %v2658_v10, %v2154_v8  ;;  %v67_v45 = vld [vmem:[%s3001_s0 + $0x8] sm:$0xff] }
  0x2e   :  { %917 = vmatpush.bf16.msra.mxu3 %v1931_v39  ;;  %v75_v13 = vld.sshfl [vmem:[#allocation1 + $0x10] sm:$0xff pattern:$0x73625140]  ;;  %v2913_v18 = vpack.c.bf16 %v73_v14, %v73_v14  ;;  %v76_v19 = vld.sshfl [vmem:[#allocation1 + $0x18] sm:$0xff pattern:$0x73625140]  ;;  %v2219_v27 = vor.u32 %v2674_v12, %v2218_v11 }
  0x2f   :  { %923 = vmatpush.bf16.msrb.mxu0 %v2051_v40  ;;  %v2911_v17 = vpack.c.bf16 %v75_v13, %v75_v13  ;;  %v74_v20 = vld.sshfl [vmem:[#allocation1 + $0x8] sm:$0xff pattern:$0x73625140]  ;;  %v2624_v23 = vld [vmem:[#allocation2 + $0x234] sm:$0xf0]  ;;  %v2915_v25 = vpack.c.bf16 %v76_v19, %v76_v19  ;;  %s2851_s28 = smov [#allocation7]  }
  0x30   :  { %936 = vmatpush.bf16.msrb.mxu1 %v2115_v41  ;;  %v2082_v24 = vld [vmem:[#allocation2 + $0x2b0] sm:$0xf]  ;;  %v2917_v26 = vpack.c.bf16 %v74_v20, %v74_v20  ;;  %v2640_v28 = vld [vmem:[#allocation2 + $0x2b4] sm:$0xf0]  ;;  %879 = vmatmul.bf16.vlgmr.msra.gmra.mxu0 %v2913_v18  ;;  %v2019_v33 = vor.u32 %v2624_v23, %v2018_v22  ;;  %v2010_v36 = vld [vmem:[#allocation2 + $0x220] sm:$0xf] }
  0x31   :  { %949 = vmatpush.bf16.msrb.mxu2 %v2179_v42  ;;  %v2146_v29 = vld [vmem:[#allocation2 + $0x330] sm:$0xf]  ;;  %v2656_v30 = vld [vmem:[#allocation2 + $0x334] sm:$0xf0]  ;;  %918 = vmatmul.bf16.vlgmr.msra.gmra.mxu3 %v2915_v25  ;;  %v2083_v34 = vor.u32 %v2640_v28, %v2082_v24  ;;  %v2622_v37 = vld [vmem:[#allocation2 + $0x224] sm:$0xf0] }
  0x32   :  { %962 = vmatpush.bf16.msrb.mxu3 %v2243_v46  ;;  %905 = vmatmul.bf16.vlgmr.msra.gmra.mxu2 %v2911_v17  ;;  %v2210_v31 = vld [vmem:[#allocation2 + $0x3b0] sm:$0xf]  ;;  %v2672_v32 = vld [vmem:[#allocation2 + $0x3b4] sm:$0xf0]  ;;  %v2147_v35 = vor.u32 %v2656_v30, %v2146_v29  ;;  %v2074_v38 = vld [vmem:[#allocation2 + $0x2a0] sm:$0xf]  ;;  %v2011_v46 = vor.u32 %v2622_v37, %v2010_v36 }
  0x33   :  { %924 = vmatpush.bf16.msrb.mxu0 %v2043_v53  ;;  %892 = vmatmul.bf16.vlgmr.msra.gmra.mxu1 %v2917_v26  ;;  %v2211_v39 = vor.u32 %v2672_v32, %v2210_v31  ;;  %v2638_v40 = vld [vmem:[#allocation2 + $0x2a4] sm:$0xf0]  ;;  %v2138_v41 = vld [vmem:[#allocation2 + $0x320] sm:$0xf]  ;;  %72 = vst [vmem:[#allocation1 + $0x20] ss:$4 sm:$0xff] %v67_v45 }
  0x34   :  { %937 = vmatpush.bf16.msrb.mxu1 %v2107_v54  ;;  %v2654_v42 = vld [vmem:[#allocation2 + $0x324] sm:$0xf0]  ;;  %v2202_v43 = vld [vmem:[#allocation2 + $0x3a0] sm:$0xf]  ;;  %v2075_v47 = vor.u32 %v2638_v40, %v2074_v38  ;;  %v2002_v49 = vld [vmem:[#allocation2 + $0x210] sm:$0xf] }
  0x35   :  { %950 = vmatpush.bf16.msrb.mxu2 %v2171_v55  ;;  %v2670_v44 = vld [vmem:[#allocation2 + $0x3a4] sm:$0xf0]  ;;  %v2139_v48 = vor.u32 %v2654_v42, %v2138_v41  ;;  %v2620_v50 = vld [vmem:[#allocation2 + $0x214] sm:$0xf0]  ;;  %v2066_v51 = vld [vmem:[#allocation2 + $0x290] sm:$0xf] }
  0x36   :  { %963 = vmatpush.bf16.msrb.mxu3 %v2235_v59  ;;  %v2203_v52 = vor.u32 %v2670_v44, %v2202_v43  ;;  %v2636_v53 = vld [vmem:[#allocation2 + $0x294] sm:$0xf0]  ;;  %v2130_v54 = vld [vmem:[#allocation2 + $0x310] sm:$0xf]  ;;  %v1994_v58 = vld [vmem:[#allocation2 + $0x200] sm:$0xf]  ;;  %v2003_v59 = vor.u32 %v2620_v50, %v2002_v49 }
  0x37   :  { %925 = vmatpush.bf16.msrb.mxu0 %v2035_v1  ;;  %v2652_v55 = vld [vmem:[#allocation2 + $0x314] sm:$0xf0]  ;;  %v2194_v56 = vld [vmem:[#allocation2 + $0x390] sm:$0xf]  ;;  %v2618_v60 = vld [vmem:[#allocation2 + $0x204] sm:$0xf0]  ;;  %v2067_v63 = vor.u32 %v2636_v53, %v2066_v51 }
  0x38   :  { %938 = vmatpush.bf16.msrb.mxu1 %v2099_v4  ;;  %v2668_v57 = vld [vmem:[#allocation2 + $0x394] sm:$0xf0]  ;;  %v2058_v61 = vld [vmem:[#allocation2 + $0x280] sm:$0xf]  ;;  %v2634_v62 = vld [vmem:[#allocation2 + $0x284] sm:$0xf0]  ;;  %v2131_v0 = vor.u32 %v2652_v55, %v2130_v54  ;;  %v1995_v11 = vor.u32 %v2618_v60, %v1994_v58 }
  0x39   :  { %951 = vmatpush.bf16.msrb.mxu2 %v2163_v5  ;;  %v2122_v1 = vld [vmem:[#allocation2 + $0x300] sm:$0xf]  ;;  %v2650_v2 = vld [vmem:[#allocation2 + $0x304] sm:$0xf0]  ;;  %v2195_v4 = vor.u32 %v2668_v57, %v2194_v56  ;;  %v2567_v6 = vld [vmem:[#allocation2 + $0x74] sm:$0xf] }
  0x3a   :  { %964 = vmatpush.bf16.msrb.mxu3 %v2227_v9  ;;  %v2186_v3 = vld [vmem:[#allocation2 + $0x380] sm:$0xf]  ;;  %v2666_v5 = vld [vmem:[#allocation2 + $0x384] sm:$0xf0]  ;;  %v1796_v7 = vld [vmem:[#allocation2 + $0x78] sm:$0xf0] }
  0x3b   :  { %926 = vmatpush.bf16.msrb.mxu0 %v2027_v15  ;;  %v2583_v8 = vld [vmem:[#allocation2 + $0xf4] sm:$0xf]  ;;  %v1860_v9 = vld [vmem:[#allocation2 + $0xf8] sm:$0xf0]  ;;  %v2059_v15 = vor.u32 %v2634_v62, %v2058_v61  ;;  %v2565_v20 = vld [vmem:[#allocation2 + $0x64] sm:$0xf]  ;;  %v2187_v22 = vor.u32 %v2666_v5, %v2186_v3  ;;  %v1799_v23 = vor.u32 %v2567_v6, %v1796_v7 }
  0x3c   :  { %939 = vmatpush.bf16.msrb.mxu1 %v2091_v16  ;;  %v2599_v10 = vld [vmem:[#allocation2 + $0x174] sm:$0xf]  ;;  %v1924_v12 = vld [vmem:[#allocation2 + $0x178] sm:$0xf0]  ;;  %v2123_v16 = vor.u32 %v2650_v2, %v2122_v1  ;;  %v1863_v28 = vor.u32 %v2583_v8, %v1860_v9  ;;  %v2581_v30 = vld [vmem:[#allocation2 + $0xe4] sm:$0xf] }
  0x3d   :  { %952 = vmatpush.bf16.msrb.mxu2 %v2155_v21  ;;  %v2615_v13 = vld [vmem:[#allocation2 + $0x1f4] sm:$0xf]  ;;  %v1988_v14 = vld [vmem:[#allocation2 + $0x1f8] sm:$0xf0]  ;;  %v1788_v21 = vld [vmem:[#allocation2 + $0x68] sm:$0xf0]  ;;  %v1927_v29 = vor.u32 %v2599_v10, %v1924_v12 }
  0x3e   :  { %965 = vmatpush.bf16.msrb.mxu3 %v2219_v27  ;;  %v79_v19 = vld.sshfl [vmem:[#allocation1 + $0x30] sm:$0xff pattern:$0x73625140]  ;;  %v77_v24 = vld.sshfl [vmem:[#allocation1 + $0x20] sm:$0xff pattern:$0x73625140]  ;;  %v1991_v32 = vor.u32 %v2615_v13, %v1988_v14  ;;  %v1791_v41 = vor.u32 %v2565_v20, %v1788_v21 }
  0x3f   :  { %927 = vmatpush.bf16.msrb.mxu0 %v2019_v33  ;;  %v80_v27 = vld.sshfl [vmem:[#allocation1 + $0x38] sm:$0xff pattern:$0x73625140]  ;;  %v78_v31 = vld.sshfl [vmem:[#allocation1 + $0x28] sm:$0xff pattern:$0x73625140]  ;;  %v2926_v33 = vpack.c.bf16 %v79_v19, %v79_v19  ;;  %v2928_v37 = vpack.c.bf16 %v77_v24, %v77_v24 }
  0x40   :  { %940 = vmatpush.bf16.msrb.mxu1 %v2083_v34  ;;  %v1852_v34 = vld [vmem:[#allocation2 + $0xe8] sm:$0xf0]  ;;  %v2930_v38 = vpack.c.bf16 %v80_v27, %v80_v27  ;;  %v2932_v42 = vpack.c.bf16 %v78_v31, %v78_v31  ;;  %v2563_v45 = vld [vmem:[#allocation2 + $0x54] sm:$0xf]  ;;  %v1844_v49 = vld [vmem:[#allocation2 + $0xd8] sm:$0xf0] }
  0x41   :  { %953 = vmatpush.bf16.msrb.mxu2 %v2147_v35  ;;  %v2597_v35 = vld [vmem:[#allocation2 + $0x164] sm:$0xf]  ;;  %v1916_v36 = vld [vmem:[#allocation2 + $0x168] sm:$0xf0]  ;;  %v1855_v43 = vor.u32 %v2581_v30, %v1852_v34  ;;  %v2595_v50 = vld [vmem:[#allocation2 + $0x154] sm:$0xf] }
  0x42   :  { %966 = vmatpush.bf16.msrb.mxu3 %v2211_v39  ;;  %v2613_v39 = vld [vmem:[#allocation2 + $0x1e4] sm:$0xf]  ;;  %v1980_v40 = vld [vmem:[#allocation2 + $0x1e8] sm:$0xf0]  ;;  %v1919_v44 = vor.u32 %v2597_v35, %v1916_v36  ;;  %v1908_v51 = vld [vmem:[#allocation2 + $0x158] sm:$0xf0] }
  0x43   :  { %928 = vmatpush.bf16.msrb.mxu0 %v2011_v46  ;;  %v1780_v46 = vld [vmem:[#allocation2 + $0x58] sm:$0xf0]  ;;  %v1911_v56 = vor.u32 %v2595_v50, %v1908_v51  ;;  %v2561_v57 = vld [vmem:[#allocation2 + $0x44] sm:$0xf]  ;;  %v1772_v58 = vld [vmem:[#allocation2 + $0x48] sm:$0xf0] }
  0x44   :  { %941 = vmatpush.bf16.msrb.mxu1 %v2075_v47  ;;  %v2579_v47 = vld [vmem:[#allocation2 + $0xd4] sm:$0xf]  ;;  %v1972_v53 = vld [vmem:[#allocation2 + $0x1d8] sm:$0xf0]  ;;  %v1783_v54 = vor.u32 %v2563_v45, %v1780_v46  ;;  %v1836_v61 = vld [vmem:[#allocation2 + $0xc8] sm:$0xf0]  ;;  %v1775_v2 = vor.u32 %v2561_v57, %v1772_v58 }
  0x45   :  { %954 = vmatpush.bf16.msrb.mxu2 %v2139_v48  ;;  %v1983_v48 = vor.u32 %v2613_v39, %v1980_v40  ;;  %v1847_v55 = vor.u32 %v2579_v47, %v1844_v49  ;;  %v2593_v62 = vld [vmem:[#allocation2 + $0x144] sm:$0xf]  ;;  %v1964_v1 = vld [vmem:[#allocation2 + $0x1c8] sm:$0xf0]  ;;  %v2559_v5 = vld [vmem:[#allocation2 + $0x34] sm:$0xf] }
  0x46   :  { %967 = vmatpush.bf16.msrb.mxu3 %v2203_v52  ;;  %v2611_v52 = vld [vmem:[#allocation2 + $0x1d4] sm:$0xf]  ;;  %v1764_v6 = vld [vmem:[#allocation2 + $0x38] sm:$0xf0]  ;;  %v2557_v19 = vld [vmem:[#allocation2 + $0x24] sm:$0xf] }
  0x47   :  { %929 = vmatpush.bf16.msrb.mxu0 %v2003_v59  ;;  %v2577_v59 = vld [vmem:[#allocation2 + $0xc4] sm:$0xf]  ;;  %v1975_v60 = vor.u32 %v2611_v52, %v1972_v53  ;;  %v2575_v7 = vld [vmem:[#allocation2 + $0xb4] sm:$0xf]  ;;  %v1828_v9 = vld [vmem:[#allocation2 + $0xb8] sm:$0xf0]  ;;  %v1767_v14 = vor.u32 %v2559_v5, %v1764_v6 }
  0x48   :  { %942 = vmatpush.bf16.msrb.mxu1 %v2067_v63  ;;  %v1900_v63 = vld [vmem:[#allocation2 + $0x148] sm:$0xf0]  ;;  %v1839_v3 = vor.u32 %v2577_v59, %v1836_v61  ;;  %v2591_v10 = vld [vmem:[#allocation2 + $0x134] sm:$0xf]  ;;  %v1956_v13 = vld [vmem:[#allocation2 + $0x1b8] sm:$0xf0] }
  0x49   :  { %955 = vmatpush.bf16.msrb.mxu2 %v2131_v0  ;;  %v2609_v0 = vld [vmem:[#allocation2 + $0x1c4] sm:$0xf]  ;;  %v2607_v12 = vld [vmem:[#allocation2 + $0x1b4] sm:$0xf]  ;;  %v1756_v20 = vld [vmem:[#allocation2 + $0x28] sm:$0xf0] }
  0x4a   :  { %968 = vmatpush.bf16.msrb.mxu3 %v2195_v4  ;;  %v1903_v4 = vor.u32 %v2593_v62, %v1900_v63  ;;  %v1967_v8 = vor.u32 %v2609_v0, %v1964_v1  ;;  %v2573_v21 = vld [vmem:[#allocation2 + $0xa4] sm:$0xf]  ;;  %v1884_v27 = vld [vmem:[#allocation2 + $0x128] sm:$0xf0]  ;;  %v1759_v30 = vor.u32 %v2557_v19, %v1756_v20  ;;  %v2555_v34 = vld [vmem:[#allocation2 + $0x14] sm:$0xf] }
  0x4b   :  { %930 = vmatpush.bf16.msrb.mxu0 %v1995_v11  ;;  %v1892_v11 = vld [vmem:[#allocation2 + $0x138] sm:$0xf0]  ;;  %v2589_v24 = vld [vmem:[#allocation2 + $0x124] sm:$0xf]  ;;  %v2571_v36 = vld [vmem:[#allocation2 + $0x94] sm:$0xf] }
  0x4c   :  { %943 = vmatpush.bf16.msrb.mxu1 %v2059_v15  ;;  %v1831_v15 = vor.u32 %v2575_v7, %v1828_v9  ;;  %v1748_v35 = vld [vmem:[#allocation2 + $0x18] sm:$0xf0]  ;;  %v2553_v47 = vld [vmem:[#allocation2 + $0x4] sm:$0xf]  ;;  %v1804_v52 = vld [vmem:[#allocation2 + $0x88] sm:$0xf0] }
  0x4d   :  { %956 = vmatpush.bf16.msrb.mxu2 %v2123_v16  ;;  %v1895_v16 = vor.u32 %v2591_v10, %v1892_v11  ;;  %v1812_v40 = vld [vmem:[#allocation2 + $0x98] sm:$0xf0]  ;;  %v1751_v46 = vor.u32 %v2555_v34, %v1748_v35  ;;  %v2569_v51 = vld [vmem:[#allocation2 + $0x84] sm:$0xf]  ;;  %v1932_v57 = vld [vmem:[#allocation2 + $0x188] sm:$0xf0] }
  0x4e   :  { %969 = vmatpush.bf16.msrb.mxu3 %v2187_v22  ;;  %931 = vmatmul.bf16.vlgmr.msrb.gmra.mxu0 %v2928_v37  ;;  %v1959_v22 = vor.u32 %v2607_v12, %v1956_v13  ;;  %v1940_v45 = vld [vmem:[#allocation2 + $0x198] sm:$0xf0]  ;;  %v1815_v49 = vor.u32 %v2571_v36, %v1812_v40  ;;  %v2585_v53 = vld [vmem:[#allocation2 + $0x104] sm:$0xf]  ;;  %v2631_v58 = vld [vmem:[#allocation2 + $0x274] sm:$0xf]  ;;  %v1807_v1 = vor.u32 %v2569_v51, %v1804_v52 }
  0x4f   :  { %975 = vmatpush.bf16.msra.mxu0 %v1799_v23  ;;  %944 = vmatmul.bf16.vlgmr.msrb.gmra.mxu1 %v2932_v42  ;;  %v1820_v23 = vld [vmem:[#allocation2 + $0xa8] sm:$0xf0]  ;;  %v2052_v59 = vld [vmem:[#allocation2 + $0x278] sm:$0xf0]  ;;  %v2663_v63 = vld [vmem:[#allocation2 + $0x374] sm:$0xf] }
  0x50   :  { %988 = vmatpush.bf16.msra.mxu1 %v1863_v28  ;;  %957 = vmatmul.bf16.vlgmr.msrb.gmra.mxu2 %v2926_v33  ;;  %v2605_v28 = vld [vmem:[#allocation2 + $0x1a4] sm:$0xf]  ;;  %v1823_v31 = vor.u32 %v2573_v21, %v1820_v23  ;;  %v2116_v62 = vld [vmem:[#allocation2 + $0x2f8] sm:$0xf0]  ;;  %v2055_v6 = vor.u32 %v2631_v58, %v2052_v59  ;;  %v2108_v12 = vld [vmem:[#allocation2 + $0x2e8] sm:$0xf0] }
  0x51   :  { %1001 = vmatpush.bf16.msra.mxu2 %v1927_v29  ;;  %970 = vmatmul.bf16.vlgmr.msrb.gmra.mxu3 %v2930_v38  ;;  %v1948_v29 = vld [vmem:[#allocation2 + $0x1a8] sm:$0xf0]  ;;  %v2180_v0 = vld [vmem:[#allocation2 + $0x378] sm:$0xf0]  ;;  %v2629_v7 = vld [vmem:[#allocation2 + $0x264] sm:$0xf] }
  0x52   :  { %1014 = vmatpush.bf16.msra.mxu3 %v1991_v32  ;;  %v1887_v32 = vor.u32 %v2589_v24, %v1884_v27  ;;  %v1951_v39 = vor.u32 %v2605_v28, %v1948_v29  ;;  %v2645_v9 = vld [vmem:[#allocation2 + $0x2e4] sm:$0xf]  ;;  %v2183_v11 = vor.u32 %v2663_v63, %v2180_v0  ;;  %v2236_v19 = vld [vmem:[#allocation2 + $0x3e8] sm:$0xf0]  ;;  %v2627_v23 = vld [vmem:[#allocation2 + $0x254] sm:$0xf] }
  0x53   :  { %976 = vmatpush.bf16.msra.mxu0 %v1791_v41  ;;  %v2587_v41 = vld [vmem:[#allocation2 + $0x114] sm:$0xf]  ;;  %v2661_v13 = vld [vmem:[#allocation2 + $0x364] sm:$0xf]  ;;  %v2111_v21 = vor.u32 %v2645_v9, %v2108_v12  ;;  %v2036_v24 = vld [vmem:[#allocation2 + $0x258] sm:$0xf0] }
  0x54   :  { %989 = vmatpush.bf16.msra.mxu1 %v1855_v43  ;;  %v1876_v43 = vld [vmem:[#allocation2 + $0x118] sm:$0xf0]  ;;  %v2643_v27 = vld [vmem:[#allocation2 + $0x2d4] sm:$0xf]  ;;  %v2039_v35 = vor.u32 %v2627_v23, %v2036_v24  ;;  %v2625_v40 = vld [vmem:[#allocation2 + $0x244] sm:$0xf] }
  0x55   :  { %1002 = vmatpush.bf16.msra.mxu2 %v1919_v44  ;;  %v2603_v44 = vld [vmem:[#allocation2 + $0x194] sm:$0xf]  ;;  %v1879_v50 = vor.u32 %v2587_v41, %v1876_v43  ;;  %v2100_v29 = vld [vmem:[#allocation2 + $0x2d8] sm:$0xf0]  ;;  %v2028_v41 = vld [vmem:[#allocation2 + $0x248] sm:$0xf0] }
  0x56   :  { %1015 = vmatpush.bf16.msra.mxu3 %v1983_v48  ;;  %v1740_v48 = vld [vmem:[#allocation2 + $0x8] sm:$0xf0]  ;;  %v2228_v34 = vld [vmem:[#allocation2 + $0x3d8] sm:$0xf0]  ;;  %v2103_v36 = vor.u32 %v2643_v27, %v2100_v29  ;;  %v2639_v51 = vld [vmem:[#allocation2 + $0x2b4] sm:$0xf] }
  0x57   :  { %977 = vmatpush.bf16.msra.mxu0 %v1783_v54  ;;  %v1943_v54 = vor.u32 %v2603_v44, %v1940_v45  ;;  %v1743_v61 = vor.u32 %v2553_v47, %v1740_v48  ;;  %v2092_v44 = vld [vmem:[#allocation2 + $0x2c8] sm:$0xf0]  ;;  %v2657_v45 = vld [vmem:[#allocation2 + $0x344] sm:$0xf]  ;;  %v2619_v9 = vld [vmem:[#allocation2 + $0x214] sm:$0xf] }
  0x58   :  { %990 = vmatpush.bf16.msra.mxu1 %v1847_v55  ;;  %v1868_v55 = vld [vmem:[#allocation2 + $0x108] sm:$0xf0]  ;;  %v2673_v47 = vld [vmem:[#allocation2 + $0x3c4] sm:$0xf]  ;;  %s1723_s29 = sshll.u32 %s2851_s28, 4  ;;  %s1725_s10 = sshll.u32 %s3010_s9, 4  ;;  %s1724_s29 = int_to_ptr.vmem [resolvable:$true] %s1723_s29  ;;  %s1726_s10 = int_to_ptr.hbm [resolvable:$true] %s1725_s10 }
  0x59   :  { %1003 = vmatpush.bf16.msra.mxu2 %v1911_v56  ;;  %v2601_v56 = vld [vmem:[#allocation2 + $0x184] sm:$0xf]  ;;  %v1996_v24 = vld [vmem:[#allocation2 + $0x208] sm:$0xf0] }
  0x5a   :  { %1016 = vmatpush.bf16.msra.mxu3 %v1975_v60  ;;  %v2647_v60 = vld [vmem:[#allocation2 + $0x2f4] sm:$0xf]  ;;  %v1935_v5 = vor.u32 %v2601_v56, %v1932_v57  ;;  %v2212_v57 = vld [vmem:[#allocation2 + $0x3b8] sm:$0xf0]  ;;  %v2637_v63 = vld [vmem:[#allocation2 + $0x2a4] sm:$0xf] }
  0x5b   :  { %978 = vmatpush.bf16.msra.mxu0 %v1775_v2  ;;  %v1871_v2 = vor.u32 %v2585_v53, %v1868_v55  ;;  %v2119_v10 = vor.u32 %v2647_v60, %v2116_v62  ;;  %v2084_v53 = vld [vmem:[#allocation2 + $0x2b8] sm:$0xf0]  ;;  %v2671_v56 = vld [vmem:[#allocation2 + $0x3b4] sm:$0xf]  ;;  %v2012_v62 = vld [vmem:[#allocation2 + $0x228] sm:$0xf0] }
  0x5c   :  { %991 = vmatpush.bf16.msra.mxu1 %v1839_v3  ;;  %v2679_v3 = vld [vmem:[#allocation2 + $0x3f4] sm:$0xf]  ;;  %v2148_v55 = vld [vmem:[#allocation2 + $0x338] sm:$0xf0]  ;;  %v2087_v59 = vor.u32 %v2639_v51, %v2084_v53  ;;  %v2215_v0 = vor.u32 %v2671_v56, %v2212_v57  ;;  %v2633_v27 = vld [vmem:[#allocation2 + $0x284] sm:$0xf] }
  0x5d   :  { %1004 = vmatpush.bf16.msra.mxu2 %v1903_v4  ;;  %v2244_v4 = vld [vmem:[#allocation2 + $0x3f8] sm:$0xf0]  ;;  %v2703_v51 = vld [vmem:[#allocation5 + $0xac] sm:$0xf0]  ;;  %v2332_v53 = vld [vmem:[#allocation5 + $0xb0] sm:$0xf0] }
  0x5e   :  { %1017 = vmatpush.bf16.msra.mxu3 %v1967_v8  ;;  %v2044_v8 = vld [vmem:[#allocation2 + $0x268] sm:$0xf0]  ;;  %v2314_v56 = vld [vmem:[#allocation5 + $0x80] sm:$0xf]  ;;  %v2699_v57 = vld [vmem:[#allocation5 + $0x8c] sm:$0xf0] }
  0x5f   :  { %979 = vmatpush.bf16.msra.mxu0 %v1767_v14  ;;  %v2247_v14 = vor.u32 %v2679_v3, %v2244_v4  ;;  %v2047_v20 = vor.u32 %v2629_v7, %v2044_v8  ;;  %v2140_v3 = vld [vmem:[#allocation2 + $0x328] sm:$0xf0]  ;;  %v2669_v4 = vld [vmem:[#allocation2 + $0x3a4] sm:$0xf] }
  0x60   :  { %992 = vmatpush.bf16.msra.mxu1 %v1831_v15  ;;  %v2172_v15 = vld [vmem:[#allocation2 + $0x368] sm:$0xf0] }
  0x61   :  { %1005 = vmatpush.bf16.msra.mxu2 %v1895_v16  ;;  %v2677_v16 = vld [vmem:[#allocation2 + $0x3e4] sm:$0xf] }
  0x62   :  { %1018 = vmatpush.bf16.msra.mxu3 %v1959_v22  ;;  %v2175_v22 = vor.u32 %v2661_v13, %v2172_v15  ;;  %v2239_v28 = vor.u32 %v2677_v16, %v2236_v19  ;;  %v2068_v13 = vld [vmem:[#allocation2 + $0x298] sm:$0xf0]  ;;  %v2667_v16 = vld [vmem:[#allocation2 + $0x394] sm:$0xf] }
  0x63   :  { %980 = vmatpush.bf16.msra.mxu0 %v1759_v30  ;;  %v2659_v30 = vld [vmem:[#allocation2 + $0x354] sm:$0xf]  ;;  %v2132_v15 = vld [vmem:[#allocation2 + $0x318] sm:$0xf0] }
  0x64   :  { %993 = vmatpush.bf16.msra.mxu1 %v1823_v31  ;;  %v2164_v31 = vld [vmem:[#allocation2 + $0x358] sm:$0xf0] }
  0x65   :  { %1006 = vmatpush.bf16.msra.mxu2 %v1887_v32  ;;  %v2675_v32 = vld [vmem:[#allocation2 + $0x3d4] sm:$0xf]  ;;  %v2196_v19 = vld [vmem:[#allocation2 + $0x398] sm:$0xf0] }
  0x66   :  { %1019 = vmatpush.bf16.msra.mxu3 %v1951_v39  ;;  %v2167_v39 = vor.u32 %v2659_v30, %v2164_v31  ;;  %v2231_v43 = vor.u32 %v2675_v32, %v2228_v34  ;;  %v2199_v29 = vor.u32 %v2667_v16, %v2196_v19  ;;  %v2649_v30 = vld [vmem:[#allocation2 + $0x304] sm:$0xf]  ;;  %v2124_v31 = vld [vmem:[#allocation2 + $0x308] sm:$0xf0]  ;;  %v2252_v16 = vld [vmem:[#allocation5 + $0x10] sm:$0xf0] }
  0x67   :  { %981 = vmatpush.bf16.msra.mxu0 %v1751_v46  ;;  %v2156_v46 = vld [vmem:[#allocation2 + $0x348] sm:$0xf0]  ;;  %v2665_v32 = vld [vmem:[#allocation2 + $0x384] sm:$0xf]  ;;  %v2370_v19 = vld [vmem:[#allocation5 + $0xe8] sm:$0xf] }
  0x68   :  { %994 = vmatpush.bf16.msra.mxu1 %v1815_v49  ;;  %v2623_v49 = vld [vmem:[#allocation2 + $0x234] sm:$0xf]  ;;  %v2188_v34 = vld [vmem:[#allocation2 + $0x388] sm:$0xf0] }
  0x69   :  { %1007 = vmatpush.bf16.msra.mxu2 %v1879_v50  ;;  %v2020_v50 = vld [vmem:[#allocation2 + $0x238] sm:$0xf0] }
  0x6a   :  { %1020 = vmatpush.bf16.msra.mxu3 %v1943_v54  ;;  %v2655_v54 = vld [vmem:[#allocation2 + $0x334] sm:$0xf]  ;;  %v2023_v58 = vor.u32 %v2623_v49, %v2020_v50  ;;  %v2330_v50 = vld [vmem:[#allocation5 + $0xa0] sm:$0xf] }
  0x6b   :  { %982 = vmatpush.bf16.msra.mxu0 %v1743_v61  ;;  %v2151_v60 = vor.u32 %v2655_v54, %v2148_v55  ;;  %v2621_v61 = vld [vmem:[#allocation2 + $0x224] sm:$0xf]  ;;  %v2331_v54 = vor.u32 %v2703_v51, %v2330_v50  ;;  %v2306_v50 = vld [vmem:[#allocation5 + $0x68] sm:$0xf]  ;;  %v2696_v51 = vld [vmem:[#allocation5 + $0x74] sm:$0xf0] }
  0x6c   :  { %995 = vmatpush.bf16.msra.mxu1 %v1807_v1  ;;  %v2076_v1 = vld [vmem:[#allocation2 + $0x2a8] sm:$0xf0] }
  0x6d   :  { %1008 = vmatpush.bf16.msra.mxu2 %v1871_v2  ;;  %v2653_v2 = vld [vmem:[#allocation2 + $0x324] sm:$0xf]  ;;  %v2079_v7 = vor.u32 %v2637_v63, %v2076_v1  ;;  %v2300_v63 = vld [vmem:[#allocation5 + $0x70] sm:$0xf0]  ;;  %v2691_v1 = vld [vmem:[#allocation5 + $0x4c] sm:$0xf0] }
  0x6e   :  { %1021 = vmatpush.bf16.msra.mxu3 %v1935_v5  ;;  %983 = vmatmul.bf16.vlgmr.msra.gmra.mxu0 %v2913_v18  ;;  %v2220_v18 = vld [vmem:[#allocation2 + $0x3c8] sm:$0xf0]  ;;  %v2143_v8 = vor.u32 %v2653_v2, %v2140_v3  ;;  %v2689_v2 = vld [vmem:[#allocation5 + $0x44] sm:$0xf] }
  0x6f   :  { %1027 = vmatpush.bf16.msrb.mxu0 %v2055_v6  ;;  %996 = vmatmul.bf16.vlgmr.msra.gmra.mxu1 %v2917_v26  ;;  %v2159_v26 = vor.u32 %v2657_v45, %v2156_v46  ;;  %v2223_v52 = vor.u32 %v2673_v47, %v2220_v18  ;;  %v2204_v5 = vld [vmem:[#allocation2 + $0x3a8] sm:$0xf0]  ;;  %v2015_v6 = vor.u32 %v2621_v61, %v2012_v62  ;;  %v2346_v47 = vld [vmem:[#allocation5 + $0xc0] sm:$0xf]  ;;  %v2707_v18 = vld [vmem:[#allocation5 + $0xcc] sm:$0xf0] }
  0x70   :  { %1040 = vmatpush.bf16.msrb.mxu1 %v2119_v10  ;;  %1009 = vmatmul.bf16.vlgmr.msra.gmra.mxu2 %v2911_v17  ;;  %v2641_v17 = vld [vmem:[#allocation2 + $0x2c4] sm:$0xf]  ;;  %v2004_v10 = vld [vmem:[#allocation2 + $0x218] sm:$0xf0]  ;;  %v2207_v12 = vor.u32 %v2669_v4, %v2204_v5  ;;  %v2284_v4 = vld [vmem:[#allocation5 + $0x50] sm:$0xf0] }
  0x71   :  { %1053 = vmatpush.bf16.msrb.mxu2 %v2183_v11  ;;  %1022 = vmatmul.bf16.vlgmr.msra.gmra.mxu3 %v2915_v25  ;;  %v2031_v25 = vor.u32 %v2625_v40, %v2028_v41  ;;  %v2095_v48 = vor.u32 %v2641_v17, %v2092_v44  ;;  %v2635_v11 = vld [vmem:[#allocation2 + $0x294] sm:$0xf]  ;;  %v2709_v40 = vld [vmem:[#allocation5 + $0xe4] sm:$0xf]  ;;  %v2191_v44 = vor.u32 %v2665_v32, %v2188_v34  ;;  %v2356_v32 = vld [vmem:[#allocation5 + $0xd8] sm:$0xf0] }
  0x72   :  { %1066 = vmatpush.bf16.msrb.mxu3 %v2247_v14  ;;  %v2651_v14 = vld [vmem:[#allocation2 + $0x314] sm:$0xf]  ;;  %v2693_v61 = vld [vmem:[#allocation5 + $0x64] sm:$0xf]  ;;  %v2287_v5 = vor.u32 %v2689_v2, %v2284_v4  ;;  %v2490_v2 = vld [vmem:[#allocation5 + $0x1e0] sm:$0xf] }
  0x73   :  { %1028 = vmatpush.bf16.msrb.mxu0 %v2047_v20  ;;  %v2007_v20 = vor.u32 %v2619_v9, %v2004_v10  ;;  %v2135_v23 = vor.u32 %v2651_v14, %v2132_v15  ;;  %v2364_v41 = vld [vmem:[#allocation5 + $0xf0] sm:$0xf0]  ;;  %v2681_v14 = vld [vmem:[#allocation5 + $0x4] sm:$0xf]  ;;  %v2276_v4 = vld [vmem:[#allocation5 + $0x38] sm:$0xf0] }
  0x74   :  { %1041 = vmatpush.bf16.msrb.mxu1 %v2111_v21  ;;  %v2617_v21 = vld [vmem:[#allocation2 + $0x204] sm:$0xf]  ;;  %v2367_v46 = vor.u32 %v2709_v40, %v2364_v41  ;;  %v2268_v10 = vld [vmem:[#allocation5 + $0x30] sm:$0xf0]  ;;  %v2340_v41 = vld [vmem:[#allocation5 + $0xb8] sm:$0xf0] }
  0x75   :  { %1054 = vmatpush.bf16.msrb.mxu2 %v2175_v22  ;;  %v2071_v22 = vor.u32 %v2635_v11, %v2068_v13  ;;  %v2683_v13 = vld [vmem:[#allocation5 + $0xc] sm:$0xf0] }
  0x76   :  { %1067 = vmatpush.bf16.msrb.mxu3 %v2239_v28  ;;  %v2060_v28 = vld [vmem:[#allocation2 + $0x288] sm:$0xf0] }
  0x77   :  { %1029 = vmatpush.bf16.msrb.mxu0 %v2039_v35  ;;  %v2362_v35 = vld [vmem:[#allocation5 + $0xe0] sm:$0xf]  ;;  %v2063_v17 = vor.u32 %v2633_v27, %v2060_v28  ;;  %v2354_v28 = vld [vmem:[#allocation5 + $0xc8] sm:$0xf] }
  0x78   :  { %1042 = vmatpush.bf16.msrb.mxu1 %v2103_v36  ;;  %v2711_v36 = vld [vmem:[#allocation5 + $0xec] sm:$0xf0] }
  0x79   :  { %1055 = vmatpush.bf16.msrb.mxu2 %v2167_v39  ;;  %v1999_v39 = vor.u32 %v2617_v21, %v1996_v24  ;;  %v2363_v45 = vor.u32 %v2711_v36, %v2362_v35  ;;  %v2255_v21 = vor.u32 %v2681_v14, %v2252_v16  ;;  %v2372_v24 = vld [vmem:[#allocation5 + $0xf8] sm:$0xf0]  ;;  %v2338_v35 = vld [vmem:[#allocation5 + $0xa8] sm:$0xf]  ;;  %v2704_v36 = vld [vmem:[#allocation5 + $0xb4] sm:$0xf0] }
  0x7a   :  { %1068 = vmatpush.bf16.msrb.mxu3 %v2231_v43  ;;  %v2127_v43 = vor.u32 %v2649_v30, %v2124_v31  ;;  %v2706_v30 = vld [vmem:[#allocation5 + $0xcc] sm:$0xf]  ;;  %v2339_v40 = vor.u32 %v2704_v36, %v2338_v35  ;;  %v2684_v14 = vld [vmem:[#allocation5 + $0x14] sm:$0xf0]  ;;  %v2735_v35 = vld [vmem:[#allocation5 + $0x1ac] sm:$0xf0] }
  0x7b   :  { %1030 = vmatpush.bf16.msrb.mxu0 %v2031_v25  ;;  %v2705_v25 = vld [vmem:[#allocation5 + $0xc4] sm:$0xf]  ;;  %v2359_v34 = vor.u32 %v2706_v30, %v2356_v32  ;;  %v2682_v16 = vld [vmem:[#allocation5 + $0xc] sm:$0xf]  ;;  %v2476_v30 = vld [vmem:[#allocation5 + $0x1d0] sm:$0xf0] }
  0x7c   :  { %1043 = vmatpush.bf16.msrb.mxu1 %v2095_v48  ;;  %v2348_v48 = vld [vmem:[#allocation5 + $0xd0] sm:$0xf0]  ;;  %v2733_v36 = vld [vmem:[#allocation5 + $0x1a4] sm:$0xf] }
  0x7d   :  { %1056 = vmatpush.bf16.msrb.mxu2 %v2159_v26  ;;  %v2347_v26 = vor.u32 %v2707_v18, %v2346_v47  ;;  %v2351_v49 = vor.u32 %v2705_v25, %v2348_v48  ;;  %v2700_v47 = vld [vmem:[#allocation5 + $0x94] sm:$0xf0]  ;;  %v2698_v18 = vld [vmem:[#allocation5 + $0x8c] sm:$0xf]  ;;  %v2324_v48 = vld [vmem:[#allocation5 + $0x98] sm:$0xf0] }
  0x7e   :  { %1069 = vmatpush.bf16.msrb.mxu3 %v2223_v52  ;;  %v2701_v52 = vld [vmem:[#allocation5 + $0xa4] sm:$0xf] }
  0x7f   :  { %1031 = vmatpush.bf16.msrb.mxu0 %v2023_v58  ;;  %v2335_v55 = vor.u32 %v2701_v52, %v2332_v53  ;;  %v2697_v58 = vld [vmem:[#allocation5 + $0x84] sm:$0xf]  ;;  %v2694_v52 = vld [vmem:[#allocation5 + $0x6c] sm:$0xf] }
  0x80   :  { %1044 = vmatpush.bf16.msrb.mxu1 %v2087_v59  ;;  %v2315_v59 = vor.u32 %v2699_v57, %v2314_v56  ;;  %v2290_v56 = vld [vmem:[#allocation5 + $0x48] sm:$0xf]  ;;  %v2692_v57 = vld [vmem:[#allocation5 + $0x54] sm:$0xf0] }
  0x81   :  { %1057 = vmatpush.bf16.msrb.mxu2 %v2151_v60 }
  0x82   :  { %1070 = vmatpush.bf16.msrb.mxu3 %v2215_v0  ;;  %v2282_v0 = vld [vmem:[#allocation5 + $0x40] sm:$0xf] }
  0x83   :  { %1032 = vmatpush.bf16.msrb.mxu0 %v2015_v6  ;;  %v2283_v3 = vor.u32 %v2691_v1, %v2282_v0  ;;  %v2266_v6 = vld [vmem:[#allocation5 + $0x20] sm:$0xf]  ;;  %v2686_v1 = vld [vmem:[#allocation5 + $0x2c] sm:$0xf] }
  0x84   :  { %1045 = vmatpush.bf16.msrb.mxu1 %v2079_v7  ;;  %v2687_v7 = vld [vmem:[#allocation5 + $0x2c] sm:$0xf0] }
  0x85   :  { %1058 = vmatpush.bf16.msrb.mxu2 %v2143_v8  ;;  %v2685_v8 = vld [vmem:[#allocation5 + $0x24] sm:$0xf]  ;;  %v2267_v9 = vor.u32 %v2687_v7, %v2266_v6  ;;  %v2492_v7 = vld [vmem:[#allocation5 + $0x1f0] sm:$0xf0] }
  0x86   :  { %1071 = vmatpush.bf16.msrb.mxu3 %v2207_v12  ;;  %v2271_v11 = vor.u32 %v2685_v8, %v2268_v10  ;;  %v2250_v12 = vld [vmem:[#allocation5] sm:$0xf]  ;;  %v2741_v6 = vld [vmem:[#allocation5 + $0x1e4] sm:$0xf] }
  0x87   :  { %1033 = vmatpush.bf16.msrb.mxu0 %v2007_v20  ;;  %v2251_v15 = vor.u32 %v2683_v13, %v2250_v12  ;;  %v2712_v20 = vld [vmem:[#allocation5 + $0xf4] sm:$0xf0]  ;;  %v2279_v12 = vor.u32 %v2686_v1, %v2276_v4  ;;  %v2258_v13 = vld [vmem:[#allocation5 + $0x8] sm:$0xf] }
  0x88   :  { %1046 = vmatpush.bf16.msrb.mxu1 %v2071_v22  ;;  %v2371_v22 = vor.u32 %v2712_v20, %v2370_v19  ;;  %v2260_v19 = vld [vmem:[#allocation5 + $0x18] sm:$0xf0] }
  0x89   :  { %1059 = vmatpush.bf16.msrb.mxu2 %v2135_v23  ;;  %v2710_v23 = vld [vmem:[#allocation5 + $0xec] sm:$0xf] }
  0x8a   :  { %1072 = vmatpush.bf16.msrb.mxu3 %v2199_v29  ;;  %v2375_v27 = vor.u32 %v2710_v23, %v2372_v24  ;;  %v2708_v29 = vld [vmem:[#allocation5 + $0xd4] sm:$0xf0]  ;;  %v2474_v24 = vld [vmem:[#allocation5 + $0x1c0] sm:$0xf] }
  0x8b   :  { %1034 = vmatpush.bf16.msrb.mxu0 %v1999_v39  ;;  %v2355_v31 = vor.u32 %v2708_v29, %v2354_v28  ;;  %v2702_v39 = vld [vmem:[#allocation5 + $0xac] sm:$0xf]  ;;  %v2737_v28 = vld [vmem:[#allocation5 + $0x1c4] sm:$0xf] }
  0x8c   :  { %1047 = vmatpush.bf16.msrb.mxu1 %v2063_v17  ;;  %v2343_v17 = vor.u32 %v2702_v39, %v2340_v41  ;;  %v2460_v39 = vld [vmem:[#allocation5 + $0x1b0] sm:$0xf0] }
  0x8d   :  { %1060 = vmatpush.bf16.msrb.mxu2 %v2127_v43  ;;  %v2949_v43 = vld [vmem:[%s3003_s2] sm:$0x3] }
  0x8e   :  { %1073 = vmatpush.bf16.msrb.mxu3 %v2191_v44  ;;  %1035 = vmatmul.bf16.vlgmr.msrb.gmra.mxu0 %v2928_v37  ;;  %v2316_v37 = vld [vmem:[#allocation5 + $0x90] sm:$0xf0] }
  0x8f   :  { %1467 = vmatpush.bf16.msra.mxu0 %v2363_v45  ;;  %1048 = vmatmul.bf16.vlgmr.msrb.gmra.mxu1 %v2932_v42  ;;  %v2319_v60 = vor.u32 %v2697_v58, %v2316_v37  ;;  %v2298_v42 = vld [vmem:[#allocation5 + $0x60] sm:$0xf] }
  0x90   :  { %1061 = vmatmul.bf16.vlgmr.msrb.gmra.mxu2 %v2926_v33  ;;  %v2695_v33 = vld [vmem:[#allocation5 + $0x6c] sm:$0xf0] }
  0x91   :  { %1493 = vmatpush.bf16.msra.mxu2 %v2367_v46  ;;  %1074 = vmatmul.bf16.vlgmr.msrb.gmra.mxu3 %v2930_v38  ;;  %v2299_v62 = vor.u32 %v2695_v33, %v2298_v42  ;;  %v2303_v38 = vor.u32 %v2693_v61, %v2300_v63  ;;  %v2322_v46 = vld [vmem:[#allocation5 + $0x88] sm:$0xf]  ;;  %v2291_v61 = vor.u32 %v2692_v57, %v2290_v56  ;;  %v2688_v63 = vld [vmem:[#allocation5 + $0x34] sm:$0xf0]  ;;  %v2725_v56 = vld [vmem:[#allocation5 + $0x164] sm:$0xf] }
  0x92   :  { %v2323_v25 = vor.u32 %v2700_v47, %v2322_v46  ;;  %v2442_v46 = vld [vmem:[#allocation5 + $0x180] sm:$0xf]  ;;  %v2731_v47 = vld [vmem:[#allocation5 + $0x18c] sm:$0xf0]  ;;  %v2428_v57 = vld [vmem:[#allocation5 + $0x170] sm:$0xf0] }
  0x93   :  { %1468 = vmatpush.bf16.msra.mxu0 %v2347_v26  ;;  %v227_v26 = vperm.slane %v2949_v43, 0 }
  0x95   :  { %1494 = vmatpush.bf16.msra.mxu2 %v2351_v49  ;;  %v2327_v49 = vor.u32 %v2698_v18, %v2324_v48  ;;  %v2729_v18 = vld [vmem:[#allocation5 + $0x184] sm:$0xf]  ;;  %v2443_v48 = vor.u32 %v2731_v47, %v2442_v46  ;;  %v2732_v46 = vld [vmem:[#allocation5 + $0x194] sm:$0xf0]  ;;  %v2730_v47 = vld [vmem:[#allocation5 + $0x18c] sm:$0xf] }
  0x97   :  { %1469 = vmatpush.bf16.msra.mxu0 %v2331_v54  ;;  %v2307_v54 = vor.u32 %v2696_v51, %v2306_v50 }
  0x99   :  { %1495 = vmatpush.bf16.msra.mxu2 %v2335_v55  ;;  %v2308_v55 = vld [vmem:[#allocation5 + $0x78] sm:$0xf0] }
  0x9a   :  { %v2311_v37 = vor.u32 %v2694_v52, %v2308_v55  ;;  %v2426_v52 = vld [vmem:[#allocation5 + $0x160] sm:$0xf] }
  0x9b   :  { %1470 = vmatpush.bf16.msra.mxu0 %v2315_v59  ;;  %v2690_v59 = vld [vmem:[#allocation5 + $0x4c] sm:$0xf] }
  0x9d   :  { %1496 = vmatpush.bf16.msra.mxu2 %v2319_v60  ;;  %v2292_v60 = vld [vmem:[#allocation5 + $0x58] sm:$0xf0] }
  0x9e   :  { %v2295_v0 = vor.u32 %v2690_v59, %v2292_v60  ;;  %v2431_v60 = vor.u32 %v2725_v56, %v2428_v57  ;;  %v2418_v56 = vld [vmem:[#allocation5 + $0x148] sm:$0xf]  ;;  %v2724_v57 = vld [vmem:[#allocation5 + $0x154] sm:$0xf0] }
  0x9f   :  { %1471 = vmatpush.bf16.msra.mxu0 %v2299_v62  ;;  %v2274_v62 = vld [vmem:[#allocation5 + $0x28] sm:$0xf] }
  0xa0   :  { %v2275_v10 = vor.u32 %v2688_v63, %v2274_v62  ;;  %v2721_v62 = vld [vmem:[#allocation5 + $0x144] sm:$0xf]  ;;  %v2412_v63 = vld [vmem:[#allocation5 + $0x150] sm:$0xf0] }
  0xa1   :  { %1497 = vmatpush.bf16.msra.mxu2 %v2303_v38  ;;  %v2415_v4 = vor.u32 %v2721_v62, %v2412_v63  ;;  %v2402_v62 = vld [vmem:[#allocation5 + $0x128] sm:$0xf] }
  0xa3   :  { %1472 = vmatpush.bf16.msra.mxu0 %v2283_v3  ;;  %v2743_v3 = vld [vmem:[#allocation5 + $0x1ec] sm:$0xf0] }
  0xa5   :  { %1498 = vmatpush.bf16.msra.mxu2 %v2287_v5  ;;  %v2491_v5 = vor.u32 %v2743_v3, %v2490_v2  ;;  %v2394_v2 = vld [vmem:[#allocation5 + $0x120] sm:$0xf]  ;;  %v2719_v3 = vld [vmem:[#allocation5 + $0x12c] sm:$0xf0] }
  0xa7   :  { %1473 = vmatpush.bf16.msra.mxu0 %v2267_v9  ;;  %v2495_v9 = vor.u32 %v2741_v6, %v2492_v7  ;;  %1480 = vmatpush.bf16.msra.mxu1 %v2491_v5  ;;  %v2717_v5 = vld [vmem:[#allocation5 + $0x124] sm:$0xf]  ;;  %v2396_v6 = vld [vmem:[#allocation5 + $0x130] sm:$0xf0]  ;;  %v2395_v7 = vor.u32 %v2719_v3, %v2394_v2  ;;  %v2386_v3 = vld [vmem:[#allocation5 + $0x108] sm:$0xf] }
  0xa9   :  { %1499 = vmatpush.bf16.msra.mxu2 %v2271_v11  ;;  %1506 = vmatpush.bf16.msra.mxu3 %v2495_v9  ;;  %v2715_v9 = vld [vmem:[#allocation5 + $0x10c] sm:$0xf0] }
  0xab   :  { %1474 = vmatpush.bf16.msra.mxu0 %v2251_v15 }
  0xad   :  { %1500 = vmatpush.bf16.msra.mxu2 %v2255_v21  ;;  %v880_v44 = vpop.f32.mrf.mxu0  ;;  %v2259_v21 = vor.u32 %v2684_v14, %v2258_v13 }
  0xae   :  { %v881_v42 = vadd.f32 %v880_v44, %v227_v26  ;;  %v2463_v44 = vor.u32 %v2733_v36, %v2460_v39  ;;  %v2444_v26 = vld [vmem:[#allocation5 + $0x190] sm:$0xf0]  ;;  %v2734_v36 = vld [vmem:[#allocation5 + $0x1ac] sm:$0xf] }
  0xaf   :  { %1519 = vmatpush.bf16.msrb.mxu0 %v2371_v22  ;;  %v2263_v22 = vor.u32 %v2682_v16, %v2260_v19  ;;  %v2447_v51 = vor.u32 %v2729_v18, %v2444_v26  ;;  %v2744_v16 = vld [vmem:[#allocation5 + $0x1f4] sm:$0xf0]  ;;  %v2742_v19 = vld [vmem:[#allocation5 + $0x1ec] sm:$0xf] }
  0xb0   :  { %v893_v45 = vpop.f32.mrf.mxu1 }
  0xb1   :  { %1545 = vmatpush.bf16.msrb.mxu2 %v2375_v27  ;;  %v894_v8 = vadd.f32 %v893_v45, %v881_v42  ;;  %v2739_v27 = vld [vmem:[#allocation5 + $0x1cc] sm:$0xf0]  ;;  %v2410_v42 = vld [vmem:[#allocation5 + $0x140] sm:$0xf] }
  0xb2   :  { %v2475_v29 = vor.u32 %v2739_v27, %v2474_v24  ;;  %v2740_v24 = vld [vmem:[#allocation5 + $0x1d4] sm:$0xf0]  ;;  %v2738_v27 = vld [vmem:[#allocation5 + $0x1cc] sm:$0xf] }
  0xb3   :  { %1520 = vmatpush.bf16.msrb.mxu0 %v2355_v31  ;;  %v2458_v31 = vld [vmem:[#allocation5 + $0x1a0] sm:$0xf] }
  0xb4   :  { %v919_v58 = vpop.f32.mrf.mxu3  ;;  %1481 = vmatpush.bf16.msra.mxu1 %v2475_v29 }
  0xb5   :  { %1546 = vmatpush.bf16.msrb.mxu2 %v2359_v34  ;;  %v906_v53 = vpop.f32.mrf.mxu2  ;;  %v882_v33 = vpop.f32.mrf.mxu0  ;;  %v2479_v34 = vor.u32 %v2737_v28, %v2476_v30  ;;  %v2484_v30 = vld [vmem:[#allocation5 + $0x1d8] sm:$0xf0] }
  0xb6   :  { %v907_v20 = vadd.f32 %v906_v53, %v894_v8  ;;  %v2727_v53 = vld [vmem:[#allocation5 + $0x16c] sm:$0xf0]  ;;  %v2378_v8 = vld [vmem:[#allocation5 + $0x100] sm:$0xf] }
  0xb7   :  { %1521 = vmatpush.bf16.msrb.mxu0 %v2339_v40  ;;  %1507 = vmatpush.bf16.msra.mxu3 %v2479_v34  ;;  %v2723_v33 = vld [vmem:[#allocation5 + $0x14c] sm:$0xf0]  ;;  %v2379_v13 = vor.u32 %v2715_v9, %v2378_v8  ;;  %v2466_v34 = vld [vmem:[#allocation5 + $0x1a8] sm:$0xf] }
  0xb8   :  { %v895_v38 = vpop.f32.mrf.mxu1  ;;  %v920_v23 = vadd.f32 %v919_v58, %v907_v20 }
  0xb9   :  { %1547 = vmatpush.bf16.msrb.mxu2 %v2343_v17  ;;  %v2459_v17 = vor.u32 %v2735_v35, %v2458_v31  ;;  %v2736_v35 = vld [vmem:[#allocation5 + $0x1b4] sm:$0xf0] }
  0xba   :  { %v2467_v39 = vor.u32 %v2736_v35, %v2466_v34 }
  0xbb   :  { %1522 = vmatpush.bf16.msrb.mxu0 %v2323_v25  ;;  %1482 = vmatpush.bf16.msra.mxu1 %v2459_v17 }
  0xbc   :  { %v921_v15 = vpop.f32.mrf.mxu3  ;;  %1508 = vmatpush.bf16.msra.mxu3 %v2463_v44 }
  0xbd   :  { %1548 = vmatpush.bf16.msrb.mxu2 %v2327_v49  ;;  %v908_v11 = vpop.f32.mrf.mxu2  ;;  %v2498_v15 = vld [vmem:[#allocation5 + $0x1e8] sm:$0xf] }
  0xbe   :  { %v2713_v11 = vld [vmem:[#allocation5 + $0x104] sm:$0xf]  ;;  %v2499_v20 = vor.u32 %v2744_v16, %v2498_v15 }
  0xbf   :  { %1523 = vmatpush.bf16.msrb.mxu0 %v2307_v54  ;;  %1483 = vmatpush.bf16.msra.mxu1 %v2443_v48  ;;  %v2452_v48 = vld [vmem:[#allocation5 + $0x198] sm:$0xf0] }
  0xc0   :  { %1509 = vmatpush.bf16.msra.mxu3 %v2447_v51  ;;  %v2434_v51 = vld [vmem:[#allocation5 + $0x168] sm:$0xf] }
  0xc1   :  { %1549 = vmatpush.bf16.msrb.mxu2 %v2311_v37  ;;  %v2427_v37 = vor.u32 %v2727_v53, %v2426_v52  ;;  %v2728_v52 = vld [vmem:[#allocation5 + $0x174] sm:$0xf0]  ;;  %v2726_v53 = vld [vmem:[#allocation5 + $0x16c] sm:$0xf] }
  0xc3   :  { %1524 = vmatpush.bf16.msrb.mxu0 %v2291_v61  ;;  %1484 = vmatpush.bf16.msra.mxu1 %v2427_v37 }
  0xc4   :  { %1510 = vmatpush.bf16.msra.mxu3 %v2431_v60  ;;  %v2420_v60 = vld [vmem:[#allocation5 + $0x158] sm:$0xf0] }
  0xc5   :  { %1550 = vmatpush.bf16.msrb.mxu2 %v2295_v0  ;;  %v2411_v0 = vor.u32 %v2723_v33, %v2410_v42  ;;  %v2419_v33 = vor.u32 %v2724_v57, %v2418_v56 }
  0xc7   :  { %1525 = vmatpush.bf16.msrb.mxu0 %v2275_v10  ;;  %1485 = vmatpush.bf16.msra.mxu1 %v2411_v0  ;;  %v2399_v10 = vor.u32 %v2717_v5, %v2396_v6  ;;  %v2404_v0 = vld [vmem:[#allocation5 + $0x138] sm:$0xf0]  ;;  %v2714_v6 = vld [vmem:[#allocation5 + $0x10c] sm:$0xf] }
  0xc8   :  { %1511 = vmatpush.bf16.msra.mxu3 %v2415_v4  ;;  %v2716_v4 = vld [vmem:[#allocation5 + $0x114] sm:$0xf0] }
  0xc9   :  { %1551 = vmatpush.bf16.msrb.mxu2 %v2279_v12  ;;  %v2380_v12 = vld [vmem:[#allocation5 + $0x110] sm:$0xf0]  ;;  %v2387_v8 = vor.u32 %v2716_v4, %v2386_v3 }
  0xca   :  { %v2383_v14 = vor.u32 %v2713_v11, %v2380_v12 }
  0xcb   :  { %1526 = vmatpush.bf16.msrb.mxu0 %v2259_v21  ;;  %v932_v32 = vpop.f32.mrf.mxu0  ;;  %1486 = vmatpush.bf16.msra.mxu1 %v2395_v7  ;;  %v2500_v21 = vld [vmem:[#allocation5 + $0x1f8] sm:$0xf0] }
  0xcc   :  { %v933_v40 = vadd.f32 %v932_v32, %v920_v23  ;;  %v945_v41 = vpop.f32.mrf.mxu1  ;;  %1512 = vmatpush.bf16.msra.mxu3 %v2399_v10  ;;  %v2482_v23 = vld [vmem:[#allocation5 + $0x1c8] sm:$0xf]  ;;  %v2487_v32 = vor.u32 %v2738_v27, %v2484_v30  ;;  %v2388_v7 = vld [vmem:[#allocation5 + $0x118] sm:$0xf0] }
  0xcd   :  { %1552 = vmatpush.bf16.msrb.mxu2 %v2263_v22  ;;  %v2503_v22 = vor.u32 %v2742_v19, %v2500_v21  ;;  %v2483_v29 = vor.u32 %v2740_v24, %v2482_v23  ;;  %v2391_v9 = vor.u32 %v2714_v6, %v2388_v7  ;;  %v2766_v7 = vld [vmem:[%s3009_s8] ss:$0 sm:$0xff] }
  0xce   :  { %v946_v45 = vadd.f32 %v945_v41, %v933_v40  ;;  %v2468_v40 = vld [vmem:[#allocation5 + $0x1b8] sm:$0xf0] }
  0xcf   :  { %1487 = vmatpush.bf16.msra.mxu1 %v2379_v13  ;;  %v2471_v17 = vor.u32 %v2734_v36, %v2468_v40  ;;  %v2752_v40 = vld [vmem:[%s3006_s5 + $0x38] sm:$0xff] }
  0xd0   :  { %1513 = vmatpush.bf16.msra.mxu3 %v2383_v14 }
  0xd3   :  { %v958_v25 = vpop.f32.mrf.mxu2  ;;  %v934_v55 = vpop.f32.mrf.mxu0  ;;  %1532 = vmatpush.bf16.msrb.mxu1 %v2499_v20 }
  0xd4   :  { %v959_v49 = vadd.f32 %v958_v25, %v946_v45  ;;  %v971_v50 = vpop.f32.mrf.mxu3  ;;  %v947_v58 = vpop.f32.mrf.mxu1  ;;  %1558 = vmatpush.bf16.msrb.mxu3 %v2503_v22  ;;  %v2450_v45 = vld [vmem:[#allocation5 + $0x188] sm:$0xf]  ;;  %v2436_v55 = vld [vmem:[#allocation5 + $0x178] sm:$0xf0] }
  0xd5   :  { %v2451_v25 = vor.u32 %v2732_v46, %v2450_v45  ;;  %v2439_v37 = vor.u32 %v2726_v53, %v2436_v55  ;;  %v2749_v45 = vld [vmem:[%s3006_s5 + $0x20] sm:$0xff]  ;;  %v2748_v46 = vld [vmem:[%s3006_s5 + $0x18] sm:$0xff]  ;;  %v2754_v55 = vld [vmem:[%s3008_s7 + $0x8] sm:$0xff] }
  0xd6   :  { %v972_v54 = vadd.f32 %v971_v50, %v959_v49  ;;  %v2455_v49 = vor.u32 %v2730_v47, %v2452_v48  ;;  %v228_v50 = vperm.slane %v2949_v43, 1  ;;  %v2720_v43 = vld [vmem:[#allocation5 + $0x134] sm:$0xf0]  ;;  %v2747_v47 = vld [vmem:[%s3006_s5 + $0x10] sm:$0xff] }
  0xd7   :  { %1533 = vmatpush.bf16.msrb.mxu1 %v2483_v29 }
  0xd8   :  { %v1079_v59 = vmax.f32 %v972_v54, 0.0  ;;  %1559 = vmatpush.bf16.msrb.mxu3 %v2487_v32  ;;  %v2435_v54 = vor.u32 %v2728_v52, %v2434_v51 }
  0xda   :  { %v1081_v61 = vpack.c.bf16 %v1079_v59, %v1079_v59  ;;  %v2722_v59 = vld [vmem:[#allocation5 + $0x14c] sm:$0xf] }
  0xdb   :  { %v960_v38 = vpop.f32.mrf.mxu2  ;;  %1534 = vmatpush.bf16.msrb.mxu1 %v2467_v39 }
  0xdc   :  { %1475 = vmatmul.bf16.vlgmr.msra.gmra.mxu0 %v1081_v61  ;;  %1501 = vmatmul.bf16.vlgmr.msra.gmra.mxu2 %v1081_v61  ;;  %v973_v1 = vpop.f32.mrf.mxu3  ;;  %v2718_v38 = vld [vmem:[#allocation5 + $0x12c] sm:$0xf] }
  0xdd   :  { %1560 = vmatpush.bf16.msrb.mxu3 %v2471_v17  ;;  %v2403_v1 = vor.u32 %v2720_v43, %v2402_v62  ;;  %v2407_v2 = vor.u32 %v2718_v38, %v2404_v0  ;;  %1649 = vmatpush.bf16.msra.mxu0 %v2752_v40  ;;  %v2751_v17 = vld [vmem:[%s3006_s5 + $0x30] sm:$0xff]  ;;  %v2753_v0 = vld [vmem:[%s3008_s7] sm:$0xff] }
  0xdf   :  { %1535 = vmatpush.bf16.msrb.mxu1 %v2451_v25  ;;  %v2745_v25 = vld [vmem:[%s3006_s5] sm:$0xff] }
  0xe1   :  { %1561 = vmatpush.bf16.msrb.mxu3 %v2455_v49  ;;  %1650 = vmatpush.bf16.msra.mxu0 %v2751_v17  ;;  %v2755_v49 = vld [vmem:[%s3008_s7 + $0x10] sm:$0xff] }
  0xe3   :  { %1536 = vmatpush.bf16.msrb.mxu1 %v2435_v54 }
  0xe5   :  { %1562 = vmatpush.bf16.msrb.mxu3 %v2439_v37 }
  0xe7   :  { %1537 = vmatpush.bf16.msrb.mxu1 %v2419_v33  ;;  %v2764_v33 = vld [vmem:[%s3005_s4] ss:$0 sm:$0xff] }
  0xeb   :  { %v984_v28 = vpop.f32.mrf.mxu0  ;;  %1538 = vmatpush.bf16.msrb.mxu1 %v2403_v1  ;;  %v2765_v1 = vld [vmem:[%s3007_s6] ss:$0 sm:$0xff] }
  0xec   :  { %1527 = vmatmul.bf16.vlgmr.msrb.gmra.mxu0 %v1081_v61  ;;  %1553 = vmatmul.bf16.vlgmr.msrb.gmra.mxu2 %v1081_v61  ;;  %v997_v31 = vpop.f32.mrf.mxu1  ;;  %v2423_v61 = vor.u32 %v2722_v59, %v2420_v60  ;;  %v985_v63 = vadd.f32 %v984_v28, %v228_v50 }
  0xee   :  { %1563 = vmatpush.bf16.msrb.mxu3 %v2423_v61  ;;  %v998_v5 = vadd.f32 %v997_v31, %v985_v63 }
  0xef   :  { %1539 = vmatpush.bf16.msrb.mxu1 %v2387_v8 }
  0xf2   :  { %1564 = vmatpush.bf16.msrb.mxu3 %v2407_v2 }
  0xf3   :  { %v1010_v41 = vpop.f32.mrf.mxu2  ;;  %v986_v18 = vpop.f32.mrf.mxu0 }
  0xf4   :  { %v1023_v44 = vpop.f32.mrf.mxu3  ;;  %v999_v26 = vpop.f32.mrf.mxu1  ;;  %v1011_v10 = vadd.f32 %v1010_v41, %v998_v5  ;;  %v2746_v18 = vld [vmem:[%s3006_s5 + $0x8] sm:$0xff] }
  0xf5   :  { %v2756_v26 = vld [vmem:[%s3008_s7 + $0x18] sm:$0xff] }
  0xf6   :  { %1565 = vmatpush.bf16.msrb.mxu3 %v2391_v9  ;;  %v1024_v11 = vadd.f32 %v1023_v44, %v1011_v10  ;;  %v2750_v44 = vld [vmem:[%s3006_s5 + $0x28] sm:$0xff] }
  0xf7   :  { %1651 = vmatpush.bf16.msra.mxu0 %v2750_v44 }
  0xfb   :  { %v1012_v58 = vpop.f32.mrf.mxu2  ;;  %1652 = vmatpush.bf16.msra.mxu0 %v2749_v45 }
  0xfc   :  { %v1025_v42 = vpop.f32.mrf.mxu3 }
  0xff   :  { %1653 = vmatpush.bf16.msra.mxu0 %v2748_v46 }
 0x103   :  { %1654 = vmatpush.bf16.msra.mxu0 %v2747_v47 }
 0x107   :  { %1655 = vmatpush.bf16.msra.mxu0 %v2746_v18 }
 0x10b   :  { %v1036_v12 = vpop.f32.mrf.mxu0  ;;  %1656 = vmatpush.bf16.msra.mxu0 %v2745_v25 }
 0x10c   :  { %v1049_v13 = vpop.f32.mrf.mxu1  ;;  %v1037_v14 = vadd.f32 %v1036_v12, %v1024_v11 }
 0x10e   :  { %v1050_v15 = vadd.f32 %v1049_v13, %v1037_v14 }
 0x113   :  { %v1062_v16 = vpop.f32.mrf.mxu2  ;;  %v1038_v21 = vpop.f32.mrf.mxu0 }
 0x114   :  { %v1063_v19 = vadd.f32 %v1062_v16, %v1050_v15  ;;  %v1075_v20 = vpop.f32.mrf.mxu3  ;;  %v1051_v22 = vpop.f32.mrf.mxu1 }
 0x116   :  { %v1076_v23 = vadd.f32 %v1075_v20, %v1063_v19 }
 0x118   :  { %v1080_v24 = vmax.f32 %v1076_v23, 0.0 }
 0x11a   :  { %v1082_v27 = vpack.c.bf16 %v1080_v24, %v1080_v24 }
 0x11b   :  { %v1064_v28 = vpop.f32.mrf.mxu2 }
 0x11c   :  { %v1077_v29 = vpop.f32.mrf.mxu3  ;;  %1488 = vmatmul.bf16.vlgmr.msra.gmra.mxu1 %v1082_v27  ;;  %1514 = vmatmul.bf16.vlgmr.msra.gmra.mxu3 %v1082_v27 }
 0x11d   :  { %1708 = vmatpush.bf16.msra.mxu1 %v2756_v26 }
 0x121   :  { %1709 = vmatpush.bf16.msra.mxu1 %v2755_v49 }
 0x125   :  { %1710 = vmatpush.bf16.msra.mxu1 %v2754_v55 }
 0x129   :  { %1711 = vmatpush.bf16.msra.mxu1 %v2753_v0 }
 0x12c   :  { %1540 = vmatmul.bf16.vlgmr.msrb.gmra.mxu1 %v1082_v27  ;;  %1566 = vmatmul.bf16.vlgmr.msrb.gmra.mxu3 %v1082_v27 }
 0x159   :  { %v1476_v30 = vpop.f32.mrf.mxu0 }
 0x15f   :  { %v1502_v31 = vpop.f32.mrf.mxu2 }
 0x161   :  { %v1478_v32 = vpop.f32.mrf.mxu0 }
 0x167   :  { %v1504_v34 = vpop.f32.mrf.mxu2 }
 0x169   :  { %v1528_v35 = vpop.f32.mrf.mxu0 }
 0x16f   :  { %v1554_v36 = vpop.f32.mrf.mxu2 }
 0x171   :  { %v1530_v39 = vpop.f32.mrf.mxu0 }
 0x177   :  { %v1556_v41 = vpop.f32.mrf.mxu2 }
 0x199   :  { %v1489_v48 = vpop.f32.mrf.mxu1 }
 0x19a   :  { %v1490_v51 = vadd.f32 %v1489_v48, %v1476_v30 }
 0x19f   :  { %v1515_v50 = vpop.f32.mrf.mxu3 }
 0x1a0   :  { %v1516_v52 = vadd.f32 %v1515_v50, %v1502_v31 }
 0x1a1   :  { %v1491_v53 = vpop.f32.mrf.mxu1 }
 0x1a2   :  { %v1571_v54 = vmax.f32 %v1490_v51, %v1516_v52 }
 0x1a7   :  { %v1517_v56 = vpop.f32.mrf.mxu3 }
 0x1a9   :  { %v1541_v57 = vpop.f32.mrf.mxu1 }
 0x1aa   :  { %v1542_v37 = vadd.f32 %v1541_v57, %v1528_v35 }
 0x1af   :  { %v1567_v58 = vpop.f32.mrf.mxu3 }
 0x1b0   :  { %v1568_v59 = vadd.f32 %v1567_v58, %v1554_v36 }
 0x1b1   :  { %v1543_v60 = vpop.f32.mrf.mxu1 }
 0x1b2   :  { %v1572_v42 = vmax.f32 %v1542_v37, %v1568_v59 }
 0x1b4   :  { %v1573_v61 = vmax.f32 %v1571_v54, %v1572_v42 }
 0x1b6   :  { %v1578_v62 = vadd.f32 %v2764_v33, %v1573_v61 }
 0x1b7   :  { %v1569_v43 = vpop.f32.mrf.mxu3 }
 0x1b8   :  { %v1579_v63 = vmax.f32 %v1578_v62, 0.0 }
 0x1ba   :  { %v1580_v38 = vpack.c.bf16 %v1579_v63, %v1579_v63 }
 0x1bc   :  { %1657 = vmatmul.bf16.vlgmr.msra.gmra.mxu0 %v1580_v38 }
 0x239   :  { %v1658_v2 = vpop.f32.mrf.mxu0 }
 0x23a   :  { %v1659_v3 = vadd.f32 %v2765_v1, %v1658_v2 }
 0x23c   :  { %v1662_v4 = vmax.f32 %v1659_v3, 0.0 }
 0x23e   :  { %v1663_v5 = vpack.c.bf16 %v1662_v4, %v1662_v4 }
 0x240   :  { %2552 = vmatmul.msk.bf16.vlgmr.msra.gmra.mxu1 %vm1700_vm0, %v1663_v5 }
 0x241   :  { %v1660_v6 = vpop.f32.mrf.mxu0 }
 0x2bd   :  { %v1713_v8 = vpop.f32.mrf.mxu1 }
 0x2be   :  { %v1714_v9 = vadd.f32 %v2766_v7, %v1713_v8 }
 0x2c0   :  { %1717 = vst [vmem:[#allocation7] sm:$0x3] %v1714_v9 }
 0x2c1   :  { %1728 = dma.vmem_to_hbm [thread:$0]  %s1724_s29, 32, %s1726_s10, [#allocation4]  }
 0x2c5   :  { %v1715_v10 = vpop.f32.mrf.mxu1 }
 0x2c6   :  { %2843 = dma.done.wait [#allocation4], 32  }
 0x2c7   :  { %2844 = vsyncadd [#allocation4], 4294967264 }
 0x2c8   :  { %1733 = vsyncpa [#allocation3], 1 }
 0x2c9   :  { %1734 = vsyncpa [#allocation6], 1 }
 0x2ca   :  { %1735 = vsyncpa [#allocation4], 1 }

</bundles_post_ra>
